<compile_context>
chip_gen: v7x
topology: tpu7x:2x2x1
jax: 0.10.0
libtpu: 0.0.40
codegen_flags: <defaults>
</compile_context>

<pallas_src>
import jax
import jax.numpy as jnp
from jax.experimental import pallas as pl
from jax.experimental.pallas import tpu as pltpu

IN_FEATURES = 1000
HIDDEN = 1024
HASH_BIT = 48

COMPUTE_DTYPE = jnp.bfloat16


def _round_up(x, m):
    return (x + m - 1) // m * m


# ---------------------------------------------------------------------------
# Kernel
# ---------------------------------------------------------------------------
def res_hash_kernel(x_ref, w1_ref, b1_ref, w2_ref, b2_ref, o_ref):
    # f32 -> bf16 cast fused into the kernel (no separate XLA pass over x).
    x = x_ref[...].astype(w1_ref.dtype)
    # First linear: [TB, 1000] bf16 @ [1000, 1024] bf16 -> f32 acc, + bias, ReLU.
    h = jnp.dot(x, w1_ref[...], preferred_element_type=jnp.float32)
    h = jnp.maximum(h + b1_ref[...], 0.0)
    # Second linear: cast activations back to bf16 for the MXU, accumulate f32.
    out = jnp.dot(h.astype(w2_ref.dtype), w2_ref[...],
                  preferred_element_type=jnp.float32)
    o_ref[...] = (out + b2_ref[...]).astype(o_ref.dtype)


# ---------------------------------------------------------------------------
# One-time parameter preparation (call once at init / checkpoint-load time)
# ---------------------------------------------------------------------------
def prepare_params(w1, b1, w2, b2):
    """Cast weights to bf16 and pad the hash_bit output dim to a lane multiple.

    Do this ONCE, outside the per-call forward path; pass the result to
    `res_hash_forward`.
    """
    K = w2.shape[1]
    K_pad = _round_up(K, 128)          # 48 -> 128 (lane-dense output store)
    return {
        "w1": w1.astype(COMPUTE_DTYPE),                                   # (1000, 1024) bf16
        "b1": b1.reshape(1, -1).astype(jnp.float32),                      # (1, 1024) f32
        "w2": jnp.pad(w2, ((0, 0), (0, K_pad - K))).astype(COMPUTE_DTYPE),  # (1024, 128) bf16
        "b2": jnp.pad(b2, (0, K_pad - K)).reshape(1, K_pad).astype(jnp.float32),
        "hash_bit": K,
    }


# ---------------------------------------------------------------------------
# Batch tiling policy
# ---------------------------------------------------------------------------
def _choose_batch_tiling(B, batch_tile):
    """Pick (tile, B_pad).

    - Tiny batches (<= 128 rows): single grid step; tiling overhead not worth it.
    - 128 < B <= 2*batch_tile: exactly 2 grid steps so v7x's two TensorCores
      both get work (the "parallel" axis only shards with >= 2 steps).
    - Larger B: fixed `batch_tile`-row tiles (default 512) to amortize the
      ~0.35 us per-grid-step overhead.
    """
    B8 = _round_up(B, 8)
    if B8 <= 128:
        return B8, B8
    if B8 <= 2 * batch_tile:
        tile = _round_up(-(-B8 // 2), 8)
    else:
        tile = batch_tile
    return tile, _round_up(B8, tile)


# ---------------------------------------------------------------------------
# Forward wrapper
# ---------------------------------------------------------------------------
def res_hash_forward(x, params, *, batch_tile=512):
    """x: [B, 1000] f32; params: output of `prepare_params`."""
    B, F = x.shape
    assert F == IN_FEATURES, (B, F)

    w1, b1, w2, b2 = params["w1"], params["b1"], params["w2"], params["b2"]
    K = params["hash_bit"]
    H = w1.shape[1]
    K_pad = w2.shape[1]

    tile, B_pad = _choose_batch_tiling(B, batch_tile)
    # Only pad the batch dim (and only when needed); x stays f32 and the
    # feature dim stays at 1000 (full-dim block is legal on the BlockSpec).
    x_in = x if B_pad == B else jnp.pad(x, ((0, B_pad - B), (0, 0)))

    grid = (B_pad // tile,)

    flops = 2 * B_pad * (F * H + H * K_pad)
    bytes_accessed = (B_pad * F * 4          # x (f32 in)
                      + w1.size * 2 + w2.size * 2
                      + b1.size * 4 + b2.size * 4
                      + B_pad * K_pad * 4)   # out (f32)

    out_padded = pl.pallas_call(
        res_hash_kernel,
        out_shape=jax.ShapeDtypeStruct((B_pad, K_pad), jnp.float32),
        grid_spec=pltpu.PrefetchScalarGridSpec(
            num_scalar_prefetch=0,
            grid=grid,
            in_specs=[
                pl.BlockSpec((tile, F), lambda i: (i, 0)),    # x tile (pipelined, f32)
                pl.BlockSpec((F, H), lambda i: (0, 0)),       # W1 (VMEM-resident)
                pl.BlockSpec((1, H), lambda i: (0, 0)),       # b1
                pl.BlockSpec((H, K_pad), lambda i: (0, 0)),   # W2 (VMEM-resident)
                pl.BlockSpec((1, K_pad), lambda i: (0, 0)),   # b2
            ],
            out_specs=pl.BlockSpec((tile, K_pad), lambda i: (i, 0)),
        ),
        compiler_params=pltpu.CompilerParams(
            dimension_semantics=("parallel",),
        ),
        cost_estimate=pl.CostEstimate(
            flops=flops, transcendentals=0, bytes_accessed=bytes_accessed),
    )(x_in, w1, b1, w2, b2)

    # Strip batch / hash_bit padding.
    return out_padded[:B, :K]


# ---------------------------------------------------------------------------
# Init + matched-precision reference
# ---------------------------------------------------------------------------
def init_params(key, hash_bit=HASH_BIT):
    """PyTorch nn.Linear-style init (U[-1/sqrt(fan_in), 1/sqrt(fan_in)]);
    weights stored already transposed ([in, out]) so the kernel does x @ W."""
    k1, k2, k3, k4 = jax.random.split(key, 4)
    bound1 = 1.0 / (IN_FEATURES ** 0.5)
    bound2 = 1.0 / (HIDDEN ** 0.5)
    w1 = jax.random.uniform(k1, (IN_FEATURES, HIDDEN), jnp.float32, -bound1, bound1)
    b1 = jax.random.uniform(k2, (HIDDEN,), jnp.float32, -bound1, bound1)
    w2 = jax.random.uniform(k3, (HIDDEN, hash_bit), jnp.float32, -bound2, bound2)
    b2 = jax.random.uniform(k4, (hash_bit,), jnp.float32, -bound2, bound2)
    return w1, b1, w2, b2


def reference_forward_matched(x, w1, b1, w2, b2):
    """Plain-JAX reference with the same bf16-input / f32-accumulate precision."""
    xb = x.astype(COMPUTE_DTYPE)
    h = jnp.dot(xb, w1.astype(COMPUTE_DTYPE), preferred_element_type=jnp.float32) + b1
    h = jnp.maximum(h, 0.0)
    return jnp.dot(h.astype(COMPUTE_DTYPE), w2.astype(COMPUTE_DTYPE),
                   preferred_element_type=jnp.float32) + b2


if __name__ == "__main__":
    key = jax.random.PRNGKey(0)
    kx, kp, kx2 = jax.random.split(key, 3)
    w1, b1, w2, b2 = init_params(kp, HASH_BIT)
    params = prepare_params(w1, b1, w2, b2)   # one-time prep, outside the hot path

    # Small batch (single grid step path).
    B = 8
    x = jax.random.normal(kx, (B, IN_FEATURES), jnp.float32)
    out = jax.block_until_ready(res_hash_forward(x, params))
    ref = reference_forward_matched(x, w1, b1, w2, b2)
    assert out.shape == (B, HASH_BIT), out.shape
    assert jnp.allclose(out, ref, atol=2e-2, rtol=2e-2), "small-batch mismatch vs reference"

    # Medium batch: exercises the >=2-step grid (v7x two-core path) and the
    # batch-padding tail (B not a multiple of the tile).
    B2 = 200
    x2 = jax.random.normal(kx2, (B2, IN_FEATURES), jnp.float32)
    out2 = jax.block_until_ready(res_hash_forward(x2, params))
    ref2 = reference_forward_matched(x2, w1, b1, w2, b2)
    assert out2.shape == (B2, HASH_BIT), out2.shape
    assert jnp.allclose(out2, ref2, atol=2e-2, rtol=2e-2), "batched mismatch vs reference"

    print("KERNEL_OK")
</pallas_src>

<mosaic_0001>
module attributes {stable_mosaic.version = 11 : i64} {
  func.func @res_hash_kernel(%arg0: i32, %arg1: memref<8x1000xf32, #tpu.memory_space<vmem>>, %arg2: memref<1000x1024xbf16, #tpu.memory_space<vmem>>, %arg3: memref<1x1024xf32, #tpu.memory_space<vmem>>, %arg4: memref<1024x128xbf16, #tpu.memory_space<vmem>>, %arg5: memref<1x128xf32, #tpu.memory_space<vmem>>, %arg6: memref<8x128xf32, #tpu.memory_space<vmem>>) attributes {dimension_semantics = [#tpu.dimension_semantics<parallel>], iteration_bounds = array<i64: 1>, scalar_prefetch = 0 : i64, scratch_operands = 0 : i64, tpu.core_type = #tpu.core_type<tc>, window_params = [{transform_indices = @transform_0, window_bounds = array<i64: 8, 1000>}, {pipeline_mode = #tpu.pipeline_mode<synchronous>, transform_indices = @transform_1, window_bounds = array<i64: 1000, 1024>}, {pipeline_mode = #tpu.pipeline_mode<synchronous>, transform_indices = @transform_2, window_bounds = array<i64: 1, 1024>}, {pipeline_mode = #tpu.pipeline_mode<synchronous>, transform_indices = @transform_3, window_bounds = array<i64: 1024, 128>}, {pipeline_mode = #tpu.pipeline_mode<synchronous>, transform_indices = @transform_4, window_bounds = array<i64: 1, 128>}, {transform_indices = @transform_5, window_bounds = array<i64: 8, 128>}]} {
    %c0 = arith.constant 0 : index
    %c0_0 = arith.constant 0 : index
    %0 = vector.load %arg1[%c0, %c0_0] : memref<8x1000xf32, #tpu.memory_space<vmem>>, vector<8x1000xf32>
    %1 = arith.truncf %0 : vector<8x1000xf32> to vector<8x1000xbf16>
    %c0_1 = arith.constant 0 : index
    %c0_2 = arith.constant 0 : index
    %2 = vector.load %arg2[%c0_1, %c0_2] : memref<1000x1024xbf16, #tpu.memory_space<vmem>>, vector<1000x1024xbf16>
    %cst = arith.constant dense<0.000000e+00> : vector<8x1024xf32>
    %3 = tpu.matmul %1, %2, %cst {dimension_numbers = #tpu.dot_dimension_numbers<[1], [0], [0], [1], [0, 0, 1, 1], [], []>} : vector<8x1000xbf16>, vector<1000x1024xbf16>, vector<8x1024xf32> -> vector<8x1024xf32>
    %c0_3 = arith.constant 0 : index
    %c0_4 = arith.constant 0 : index
    %4 = vector.load %arg3[%c0_3, %c0_4] : memref<1x1024xf32, #tpu.memory_space<vmem>>, vector<1x1024xf32>
    %5 = vector.broadcast %4 : vector<1x1024xf32> to vector<8x1024xf32>
    %6 = arith.addf %3, %5 : vector<8x1024xf32>
    %cst_5 = arith.constant 0.000000e+00 : f32
    %7 = vector.broadcast %cst_5 : f32 to vector<8x1024xf32>
    %8 = arith.maximumf %6, %7 : vector<8x1024xf32>
    %9 = arith.truncf %8 : vector<8x1024xf32> to vector<8x1024xbf16>
    %c0_6 = arith.constant 0 : index
    %c0_7 = arith.constant 0 : index
    %10 = vector.load %arg4[%c0_6, %c0_7] : memref<1024x128xbf16, #tpu.memory_space<vmem>>, vector<1024x128xbf16>
    %cst_8 = arith.constant dense<0.000000e+00> : vector<8x128xf32>
    %11 = tpu.matmul %9, %10, %cst_8 {dimension_numbers = #tpu.dot_dimension_numbers<[1], [0], [0], [1], [0, 0, 1, 1], [], []>} : vector<8x1024xbf16>, vector<1024x128xbf16>, vector<8x128xf32> -> vector<8x128xf32>
    %c0_9 = arith.constant 0 : index
    %c0_10 = arith.constant 0 : index
    %12 = vector.load %arg5[%c0_9, %c0_10] : memref<1x128xf32, #tpu.memory_space<vmem>>, vector<1x128xf32>
    %13 = vector.broadcast %12 : vector<1x128xf32> to vector<8x128xf32>
    %14 = arith.addf %11, %13 : vector<8x128xf32>
    %c0_11 = arith.constant 0 : index
    %c0_12 = arith.constant 0 : index
    %15 = vector.load %arg6[%c0_11, %c0_12] : memref<8x128xf32, #tpu.memory_space<vmem>>, vector<8x128xf32>
    tpu.vector_store %arg6[%c0_11, %c0_12], %14 {strides = array<i32>} : memref<8x128xf32, #tpu.memory_space<vmem>>, vector<8x128xf32>,
    return
  }
  func.func @transform_0(%arg0: i32) -> (i32, i32) {
    %c0_i32 = arith.constant 0 : i32
    %c0_i32_0 = arith.constant 0 : i32
    return %arg0, %c0_i32 : i32, i32
  }
  func.func @transform_1(%arg0: i32) -> (i32, i32) {
    %c0_i32 = arith.constant 0 : i32
    %c0_i32_0 = arith.constant 0 : i32
    %c0_i32_1 = arith.constant 0 : i32
    return %c0_i32, %c0_i32_0 : i32, i32
  }
  func.func @transform_2(%arg0: i32) -> (i32, i32) {
    %c0_i32 = arith.constant 0 : i32
    %c0_i32_0 = arith.constant 0 : i32
    %c0_i32_1 = arith.constant 0 : i32
    return %c0_i32, %c0_i32_0 : i32, i32
  }
  func.func @transform_3(%arg0: i32) -> (i32, i32) {
    %c0_i32 = arith.constant 0 : i32
    %c0_i32_0 = arith.constant 0 : i32
    %c0_i32_1 = arith.constant 0 : i32
    return %c0_i32, %c0_i32_0 : i32, i32
  }
  func.func @transform_4(%arg0: i32) -> (i32, i32) {
    %c0_i32 = arith.constant 0 : i32
    %c0_i32_0 = arith.constant 0 : i32
    %c0_i32_1 = arith.constant 0 : i32
    return %c0_i32, %c0_i32_0 : i32, i32
  }
  func.func @transform_5(%arg0: i32) -> (i32, i32) {
    %c0_i32 = arith.constant 0 : i32
    %c0_i32_0 = arith.constant 0 : i32
    return %arg0, %c0_i32 : i32, i32
  }
}

</mosaic_0001>

<bundles_post_ra>
// kernel: tpu_custom_call.1
= control target key start
LH: loop header
LB: loop body
LE: loop exit
PB: predicated region body
PF: predicated region fallthrough
CT: control target
= control target key end

     0   :  { %10 = vsyncpa [#allocation3], 0  ;;  %s5687_s0 = inlined_call_operand.hbm [shape: f32[8,1000], index: 0, kind: input, shape index: {}]   ;;  %s5688_s1 = inlined_call_operand.hbm [shape: bf16[1000,1024], index: 1, kind: input, shape index: {}]   ;;  %s5689_s2 = inlined_call_operand.hbm [shape: f32[1,1024], index: 2, kind: input, shape index: {}]   ;;  %s5690_s3 = inlined_call_operand.hbm [shape: bf16[1024,128], index: 3, kind: input, shape index: {}]   ;;  %s5691_s4 = inlined_call_operand.hbm [shape: f32[1,128], index: 4, kind: input, shape index: {}]   ;;  %s5692_s5 = inlined_call_operand.hbm [shape: f32[8,128], index: 5, kind: output, shape index: {}]  }
   0x1   :  { %11 = vsyncpa [#allocation6], 0 }
   0x2   :  { %12 = vsyncpa [#allocation9], 0 }
   0x3   :  { %13 = vsyncpa [#allocation4], 0  ;;  %s5483_s18 = smov [#allocation5]   ;;  %s5343_s22 = scalar_lea.hbm %s5688_s1, 64000 }
   0x4   :  { %s29_s19 = sshll.u32 %s5483_s18, 4  ;;  %p5344_p0 = scmp.ne.s32.totalorder %s5688_s1, %s5343_s22  ;;  %s30_s19 = int_to_ptr.vmem [resolvable:$true] %s29_s19 }
   0x5   :  { %p5347_p1 = scmp.lt.u32.totalorder %s5343_s22, %s5688_s1 }
   0x7   :  { %p5349_p2 = pnand %p5347_p1, %p5344_p0 }
   0x9   :  { %5352 = shalt.err (!%p5349_p2)
}
   0xa   :  { %s5353_s27 = scalar_lea.vmem %s30_s19, 64000  ;;  %p5358_p4 = scmp.lt.s32.totalorder %s30_s19, %s30_s19 }
   0xb   :  { %p5354_p3 = scmp.ne.s32.totalorder %s30_s19, %s5353_s27  ;;  %p5359_p5 = scmp.lt.s32.totalorder %s5353_s27, %s5353_s27 }
   0xd   :  { %p5360_p6 = por %p5359_p5, %p5358_p4 }
   0xf   :  { %p5361_p7 = pnand %p5360_p6, %p5354_p3 }
  0x11   :  { %5364 = shalt.err (!%p5361_p7)
}
  0x12   :  { %s5484_s28 = smov 512   ;;  %s5485_s29 = smov 32  }
  0x13   :  { %35 = dma.hbm_to_vmem [thread:$0]  %s5688_s1, 64000, %s30_s19, [#allocation6], %s5484_s28, %s5484_s28, %s5485_s29  }
  0x14   :  { %s5486_s7 = smov [#allocation8]   ;;  %s5365_s11 = scalar_lea.hbm %s5690_s3, 8192 }
  0x15   :  { %s51_s8 = sshll.u32 %s5486_s7, 4  ;;  %p5366_p8 = scmp.ne.s32.totalorder %s5690_s3, %s5365_s11  ;;  %s52_s8 = int_to_ptr.vmem [resolvable:$true] %s51_s8 }
  0x16   :  { %p5369_p9 = scmp.lt.u32.totalorder %s5365_s11, %s5690_s3 }
  0x18   :  { %p5371_p10 = pnand %p5369_p9, %p5366_p8 }
  0x1a   :  { %5374 = shalt.err (!%p5371_p10)
}
  0x1b   :  { %s5375_s16 = scalar_lea.vmem %s52_s8, 8192  ;;  %p5380_p12 = scmp.lt.s32.totalorder %s52_s8, %s52_s8 }
  0x1c   :  { %p5376_p11 = scmp.ne.s32.totalorder %s52_s8, %s5375_s16  ;;  %p5381_p13 = scmp.lt.s32.totalorder %s5375_s16, %s5375_s16 }
  0x1e   :  { %p5382_p0 = por %p5381_p13, %p5380_p12 }
  0x20   :  { %p5383_p1 = pnand %p5382_p0, %p5376_p11 }
  0x22   :  { %5386 = shalt.err (!%p5383_p1)
}
  0x23   :  { %s5487_s1 = smov 64   ;;  %s5488_s17 = smov 4  }
  0x24   :  { %57 = dma.hbm_to_vmem [thread:$0]  %s5690_s3, 8192, %s52_s8, [#allocation9], %s5487_s1, %s5487_s1, %s5488_s17  }
  0x25   :  { %s5489_s20 = smov [#allocation2]   ;;  %s5490_s22 = smov [#allocation7]  }
  0x26   :  { %s20_s21 = sshll.u32 %s5489_s20, 4  ;;  %s42_s23 = sshll.u32 %s5490_s22, 4  ;;  %s21_s21 = int_to_ptr.vmem [resolvable:$true] %s20_s21  ;;  %s43_s23 = int_to_ptr.vmem [resolvable:$true] %s42_s23 }
  0x27   :  { %s5387_s26 = scalar_lea.hbm %s5687_s0, 1024 }
  0x28   :  { %p5388_p2 = scmp.ne.s32.totalorder %s5687_s0, %s5387_s26  ;;  %p5391_p3 = scmp.lt.u32.totalorder %s5387_s26, %s5687_s0 }
  0x2a   :  { %p5393_p4 = pnand %p5391_p3, %p5388_p2 }
  0x2c   :  { %5396 = shalt.err (!%p5393_p4)
}
  0x2d   :  { %s5397_s3 = scalar_lea.vmem %s21_s21, 1024  ;;  %p5402_p6 = scmp.lt.s32.totalorder %s21_s21, %s21_s21 }
  0x2e   :  { %p5398_p5 = scmp.ne.s32.totalorder %s21_s21, %s5397_s3  ;;  %p5403_p7 = scmp.lt.s32.totalorder %s5397_s3, %s5397_s3 }
  0x30   :  { %p5404_p8 = por %p5403_p7, %p5402_p6 }
  0x32   :  { %p5405_p9 = pnand %p5404_p8, %p5398_p5 }
  0x34   :  { %5408 = shalt.err (!%p5405_p9)
}
  0x35   :  { %23 = dma.hbm_to_vmem [thread:$0]  %s5687_s0, 1024, %s21_s21, [#allocation3]  }
  0x36   :  { %s5409_s10 = scalar_lea.hbm %s5689_s2, 128 }
  0x37   :  { %p5410_p10 = scmp.ne.s32.totalorder %s5689_s2, %s5409_s10  ;;  %p5413_p11 = scmp.lt.u32.totalorder %s5409_s10, %s5689_s2 }
  0x39   :  { %p5415_p12 = pnand %p5413_p11, %p5410_p10 }
  0x3b   :  { %5418 = shalt.err (!%p5415_p12)
}
  0x3c   :  { %s5419_s15 = scalar_lea.vmem %s43_s23, 128  ;;  %p5424_p0 = scmp.lt.s32.totalorder %s43_s23, %s43_s23 }
  0x3d   :  { %p5420_p13 = scmp.ne.s32.totalorder %s43_s23, %s5419_s15  ;;  %p5425_p1 = scmp.lt.s32.totalorder %s5419_s15, %s5419_s15 }
  0x3f   :  { %p5426_p2 = por %p5425_p1, %p5424_p0 }
  0x41   :  { %p5427_p3 = pnand %p5426_p2, %p5420_p13 }
  0x43   :  { %5430 = shalt.err (!%p5427_p3)
}
  0x44   :  { %45 = dma.hbm_to_vmem [thread:$0]  %s5689_s2, 128, %s43_s23, [#allocation6]  }
  0x45   :  { %s5491_s1 = smov [#allocation10]   ;;  %s5431_s20 = scalar_lea.hbm %s5691_s4, 16 }
  0x46   :  { %s64_s17 = sshll.u32 %s5491_s1, 4  ;;  %p5432_p4 = scmp.ne.s32.totalorder %s5691_s4, %s5431_s20  ;;  %s65_s17 = int_to_ptr.vmem [resolvable:$true] %s64_s17 }
  0x47   :  { %p5435_p5 = scmp.lt.u32.totalorder %s5431_s20, %s5691_s4 }
  0x49   :  { %p5437_p6 = pnand %p5435_p5, %p5432_p4 }
  0x4b   :  { %5440 = shalt.err (!%p5437_p6)
}
  0x4c   :  { %s5441_s26 = scalar_lea.vmem %s65_s17, 16  ;;  %s5445_s2 = scalar_lea.vmem %s65_s17, 32 }
  0x4d   :  { %p5442_p7 = scmp.ne.s32.totalorder %s65_s17, %s5441_s26  ;;  %p5446_p8 = scmp.lt.s32.totalorder %s65_s17, %s65_s17 }
  0x4e   :  { %p5447_p9 = scmp.lt.s32.totalorder %s5445_s2, %s5441_s26 }
  0x50   :  { %p5448_p10 = por %p5447_p9, %p5446_p8 }
  0x52   :  { %p5449_p11 = pnand %p5448_p10, %p5442_p7 }
  0x54   :  { %5452 = shalt.err (!%p5449_p11)
}
  0x55   :  { %67 = dma.hbm_to_vmem [thread:$0]  %s5691_s4, 16, %s65_s17, [#allocation9]  }
  0x56   :  { %5475 = dma.done.wait [#allocation3], 1024  }
  0x57   :  { %5476 = vsyncadd [#allocation3], 4294966272 }
  0x58   :  { %5477 = dma.done.wait [#allocation6], 64128  }
  0x59   :  { %5478 = vsyncadd [#allocation6], 4294903168 }
  0x5a   :  { %5479 = dma.done.wait [#allocation9], 8208  }
  0x5b   :  { %5480 = vsyncadd [#allocation9], 4294959088  ;;  %v100_v0 = vld [vmem:[#allocation5] sm:$0xff]  ;;  %v101_v2 = vld [vmem:[#allocation5 + $0x8] sm:$0xff]  ;;  %vm3142_vm0 = vcmask 850944   ;;  %vm3146_vm1 = vcmask 1043456  }
  0x5c   :  { %v104_v1 = vld [vmem:[#allocation5 + $0x20] sm:$0xff]  ;;  %v105_v4 = vld [vmem:[#allocation5 + $0x28] sm:$0xff]  ;;  %s5492_s4 = smov [#allocation11]  }
  0x5d   :  { %v4541_v3 = vcombine.high %v100_v0, %v104_v1  ;;  %v4540_v5 = vcombine.low %v100_v0, %v104_v1  ;;  %v108_v6 = vld [vmem:[#allocation5 + $0x40] sm:$0xff]  ;;  %v4543_v8 = vcombine.high %v101_v2, %v105_v4  ;;  %v4542_v9 = vcombine.low %v101_v2, %v105_v4  ;;  %v109_v11 = vld [vmem:[#allocation5 + $0x48] sm:$0xff]  ;;  %s4529_s28 = sshll.u32 %s5492_s4, 4  ;;  %s4530_s28 = int_to_ptr.vmem [resolvable:$true] %s4529_s28 }
  0x5e   :  { %v112_v7 = vld [vmem:[#allocation5 + $0x60] sm:$0xff]  ;;  %v113_v12 = vld [vmem:[#allocation5 + $0x68] sm:$0xff]  ;;  %s5453_s29 = scalar_lea.vmem %s4530_s28, 128  ;;  %p5458_p13 = scmp.lt.s32.totalorder %s4530_s28, %s4530_s28 }
  0x5f   :  { %v4549_v10 = vcombine.high %v108_v6, %v112_v7  ;;  %v116_v13 = vld [vmem:[#allocation5 + $0x80] sm:$0xff]  ;;  %3171 = vmatprep.subr.bf16.mxu0 %v4541_v3  ;;  %v4551_v14 = vcombine.high %v109_v11, %v113_v12  ;;  %v117_v16 = vld [vmem:[#allocation5 + $0x88] sm:$0xff]  ;;  %3335 = vmatprep.subr.bf16.mxu1 %v4543_v8  ;;  %v4548_v18 = vcombine.low %v108_v6, %v112_v7  ;;  %p5454_p12 = scmp.ne.s32.totalorder %s4530_s28, %s5453_s29  ;;  %p5459_p0 = scmp.lt.s32.totalorder %s5453_s29, %s5453_s29 }
  0x60   :  { %v120_v15 = vld [vmem:[#allocation5 + $0xa0] sm:$0xff]  ;;  %v121_v17 = vld [vmem:[#allocation5 + $0xa8] sm:$0xff]  ;;  %3172 = vmatpush1.bf16.msra.mxu0 %v4540_v5  ;;  %3336 = vmatpush1.bf16.msra.mxu1 %v4542_v9  ;;  %v4550_v19 = vcombine.low %v109_v11, %v113_v12 }
  0x61   :  { %3173 = vmatprep.subr.bf16.mxu0 %v4549_v10  ;;  %v4557_v20 = vcombine.high %v116_v13, %v120_v15  ;;  %3337 = vmatprep.subr.bf16.mxu1 %v4551_v14  ;;  %v4559_v21 = vcombine.high %v117_v16, %v121_v17  ;;  %v124_v22 = vld [vmem:[#allocation5 + $0xc0] sm:$0xff]  ;;  %v125_v24 = vld [vmem:[#allocation5 + $0xc8] sm:$0xff]  ;;  %v4556_v26 = vcombine.low %v116_v13, %v120_v15  ;;  %p5460_p1 = por %p5459_p0, %p5458_p13 }
  0x62   :  { %v128_v23 = vld [vmem:[#allocation5 + $0xe0] sm:$0xff]  ;;  %v129_v25 = vld [vmem:[#allocation5 + $0xe8] sm:$0xff]  ;;  %v4558_v27 = vcombine.low %v117_v16, %v121_v17 }
  0x63   :  { %v4565_v28 = vcombine.high %v124_v22, %v128_v23  ;;  %v4567_v29 = vcombine.high %v125_v24, %v129_v25  ;;  %v132_v30 = vld [vmem:[#allocation5 + $0x100] sm:$0xff]  ;;  %v133_v32 = vld [vmem:[#allocation5 + $0x108] sm:$0xff]  ;;  %v4564_v34 = vcombine.low %v124_v22, %v128_v23  ;;  %v4566_v35 = vcombine.low %v125_v24, %v129_v25  ;;  %p5461_p2 = pnand %p5460_p1, %p5454_p12 }
  0x64   :  { %3174 = vmatpush1.bf16.msra.mxu0 %v4548_v18  ;;  %3338 = vmatpush1.bf16.msra.mxu1 %v4550_v19  ;;  %v136_v31 = vld [vmem:[#allocation5 + $0x120] sm:$0xff]  ;;  %v137_v33 = vld [vmem:[#allocation5 + $0x128] sm:$0xff] }
  0x65   :  { %3175 = vmatprep.subr.bf16.mxu0 %v4557_v20  ;;  %3339 = vmatprep.subr.bf16.mxu1 %v4559_v21  ;;  %v4573_v36 = vcombine.high %v132_v30, %v136_v31  ;;  %v4575_v37 = vcombine.high %v133_v32, %v137_v33  ;;  %v140_v38 = vld [vmem:[#allocation5 + $0x140] sm:$0xff]  ;;  %v141_v40 = vld [vmem:[#allocation5 + $0x148] sm:$0xff]  ;;  %v4572_v42 = vcombine.low %v132_v30, %v136_v31 }
  0x66   :  { %v144_v39 = vld [vmem:[#allocation5 + $0x160] sm:$0xff]  ;;  %v145_v41 = vld [vmem:[#allocation5 + $0x168] sm:$0xff]  ;;  %v4574_v43 = vcombine.low %v133_v32, %v137_v33 }
  0x67   :  { %v4581_v44 = vcombine.high %v140_v38, %v144_v39  ;;  %v4583_v45 = vcombine.high %v141_v40, %v145_v41  ;;  %v148_v46 = vld [vmem:[#allocation5 + $0x180] sm:$0xff]  ;;  %v149_v48 = vld [vmem:[#allocation5 + $0x188] sm:$0xff]  ;;  %v4580_v50 = vcombine.low %v140_v38, %v144_v39  ;;  %v4582_v51 = vcombine.low %v141_v40, %v145_v41 }
  0x68   :  { %3176 = vmatpush1.bf16.msra.mxu0 %v4556_v26  ;;  %3340 = vmatpush1.bf16.msra.mxu1 %v4558_v27  ;;  %v152_v47 = vld [vmem:[#allocation5 + $0x1a0] sm:$0xff]  ;;  %v153_v49 = vld [vmem:[#allocation5 + $0x1a8] sm:$0xff] }
  0x69   :  { %3177 = vmatprep.subr.bf16.mxu0 %v4565_v28  ;;  %3341 = vmatprep.subr.bf16.mxu1 %v4567_v29  ;;  %v4589_v52 = vcombine.high %v148_v46, %v152_v47  ;;  %v85_v53 = vld [vmem:[#allocation2 + $0x8] sm:$0xff]  ;;  %v4591_v54 = vcombine.high %v149_v48, %v153_v49  ;;  %v156_v55 = vld [vmem:[#allocation5 + $0x1c0] sm:$0xff]  ;;  %v4588_v60 = vcombine.low %v148_v46, %v152_v47 }
  0x6a   :  { %v160_v56 = vld [vmem:[#allocation5 + $0x1e0] sm:$0xff]  ;;  %v5583_v57 = vpack.c.bf16 %v85_v53, %v85_v53  ;;  %v157_v58 = vld [vmem:[#allocation5 + $0x1c8] sm:$0xff]  ;;  %v4590_v61 = vcombine.low %v149_v48, %v153_v49 }
  0x6b   :  { %v161_v59 = vld [vmem:[#allocation5 + $0x1e8] sm:$0xff]  ;;  %v4597_v62 = vcombine.high %v156_v55, %v160_v56  ;;  %v164_v0 = vld [vmem:[#allocation5 + $0x200] sm:$0xff]  ;;  %v4596_v4 = vcombine.low %v156_v55, %v160_v56 }
  0x6c   :  { %3178 = vmatpush1.bf16.msra.mxu0 %v4564_v34  ;;  %3342 = vmatpush1.bf16.msra.mxu1 %v4566_v35  ;;  %v4599_v63 = vcombine.high %v157_v58, %v161_v59  ;;  %v168_v1 = vld [vmem:[#allocation5 + $0x220] sm:$0xff]  ;;  %v165_v2 = vld [vmem:[#allocation5 + $0x208] sm:$0xff]  ;;  %v4598_v5 = vcombine.low %v157_v58, %v161_v59 }
  0x6d   :  { %3179 = vmatprep.subr.bf16.mxu0 %v4573_v36  ;;  %3343 = vmatprep.subr.bf16.mxu1 %v4575_v37  ;;  %v169_v3 = vld [vmem:[#allocation5 + $0x228] sm:$0xff]  ;;  %v4605_v6 = vcombine.high %v164_v0, %v168_v1  ;;  %v172_v8 = vld [vmem:[#allocation5 + $0x240] sm:$0xff]  ;;  %v4604_v12 = vcombine.low %v164_v0, %v168_v1 }
  0x6e   :  { %3203 = vmatprep.mubr.bf16.mxu0 %v5583_v57  ;;  %3367 = vmatprep.mubr.bf16.mxu1 %v5583_v57  ;;  %v4607_v7 = vcombine.high %v165_v2, %v169_v3  ;;  %v176_v9 = vld [vmem:[#allocation5 + $0x260] sm:$0xff]  ;;  %v173_v10 = vld [vmem:[#allocation5 + $0x248] sm:$0xff]  ;;  %v4606_v13 = vcombine.low %v165_v2, %v169_v3 }
  0x6f   :  { %v177_v11 = vld [vmem:[#allocation5 + $0x268] sm:$0xff]  ;;  %v4613_v14 = vcombine.high %v172_v8, %v176_v9  ;;  %v180_v16 = vld [vmem:[#allocation5 + $0x280] sm:$0xff]  ;;  %v4612_v20 = vcombine.low %v172_v8, %v176_v9 }
  0x70   :  { %3180 = vmatpush1.bf16.msra.mxu0 %v4572_v42  ;;  %3344 = vmatpush1.bf16.msra.mxu1 %v4574_v43  ;;  %v4615_v15 = vcombine.high %v173_v10, %v177_v11  ;;  %v184_v17 = vld [vmem:[#allocation5 + $0x2a0] sm:$0xff]  ;;  %v181_v18 = vld [vmem:[#allocation5 + $0x288] sm:$0xff]  ;;  %v4614_v21 = vcombine.low %v173_v10, %v177_v11 }
  0x71   :  { %3181 = vmatprep.subr.bf16.mxu0 %v4581_v44  ;;  %3345 = vmatprep.subr.bf16.mxu1 %v4583_v45  ;;  %v185_v19 = vld [vmem:[#allocation5 + $0x2a8] sm:$0xff]  ;;  %v4621_v22 = vcombine.high %v180_v16, %v184_v17  ;;  %v188_v24 = vld [vmem:[#allocation5 + $0x2c0] sm:$0xff]  ;;  %v4620_v28 = vcombine.low %v180_v16, %v184_v17 }
  0x72   :  { %v4623_v23 = vcombine.high %v181_v18, %v185_v19  ;;  %v192_v25 = vld [vmem:[#allocation5 + $0x2e0] sm:$0xff]  ;;  %v189_v26 = vld [vmem:[#allocation5 + $0x2c8] sm:$0xff]  ;;  %v4622_v29 = vcombine.low %v181_v18, %v185_v19 }
  0x73   :  { %v193_v27 = vld [vmem:[#allocation5 + $0x2e8] sm:$0xff]  ;;  %v4629_v30 = vcombine.high %v188_v24, %v192_v25  ;;  %v196_v32 = vld [vmem:[#allocation5 + $0x300] sm:$0xff]  ;;  %v4628_v36 = vcombine.low %v188_v24, %v192_v25 }
  0x74   :  { %3182 = vmatpush1.bf16.msra.mxu0 %v4580_v50  ;;  %3346 = vmatpush1.bf16.msra.mxu1 %v4582_v51  ;;  %v4631_v31 = vcombine.high %v189_v26, %v193_v27  ;;  %v200_v33 = vld [vmem:[#allocation5 + $0x320] sm:$0xff]  ;;  %v197_v34 = vld [vmem:[#allocation5 + $0x308] sm:$0xff]  ;;  %v4630_v37 = vcombine.low %v189_v26, %v193_v27 }
  0x75   :  { %3183 = vmatprep.subr.bf16.mxu0 %v4589_v52  ;;  %3347 = vmatprep.subr.bf16.mxu1 %v4591_v54  ;;  %v201_v35 = vld [vmem:[#allocation5 + $0x328] sm:$0xff]  ;;  %v4637_v38 = vcombine.high %v196_v32, %v200_v33  ;;  %v204_v40 = vld [vmem:[#allocation5 + $0x340] sm:$0xff]  ;;  %v4636_v44 = vcombine.low %v196_v32, %v200_v33 }
  0x76   :  { %v4639_v39 = vcombine.high %v197_v34, %v201_v35  ;;  %v208_v41 = vld [vmem:[#allocation5 + $0x360] sm:$0xff]  ;;  %v205_v42 = vld [vmem:[#allocation5 + $0x348] sm:$0xff]  ;;  %v4638_v45 = vcombine.low %v197_v34, %v201_v35 }
  0x77   :  { %v209_v43 = vld [vmem:[#allocation5 + $0x368] sm:$0xff]  ;;  %v4645_v46 = vcombine.high %v204_v40, %v208_v41  ;;  %v212_v48 = vld [vmem:[#allocation5 + $0x380] sm:$0xff]  ;;  %v4644_v52 = vcombine.low %v204_v40, %v208_v41 }
  0x78   :  { %3184 = vmatpush1.bf16.msra.mxu0 %v4588_v60  ;;  %3348 = vmatpush1.bf16.msra.mxu1 %v4590_v61  ;;  %v4647_v47 = vcombine.high %v205_v42, %v209_v43  ;;  %v216_v49 = vld [vmem:[#allocation5 + $0x3a0] sm:$0xff]  ;;  %v213_v50 = vld [vmem:[#allocation5 + $0x388] sm:$0xff]  ;;  %v4646_v53 = vcombine.low %v205_v42, %v209_v43 }
  0x79   :  { %3185 = vmatprep.subr.bf16.mxu0 %v4597_v62  ;;  %3349 = vmatprep.subr.bf16.mxu1 %v4599_v63  ;;  %v217_v51 = vld [vmem:[#allocation5 + $0x3a8] sm:$0xff]  ;;  %v4653_v54 = vcombine.high %v212_v48, %v216_v49  ;;  %v220_v56 = vld [vmem:[#allocation5 + $0x3c0] sm:$0xff]  ;;  %v4652_v61 = vcombine.low %v212_v48, %v216_v49 }
  0x7a   :  { %v4655_v55 = vcombine.high %v213_v50, %v217_v51  ;;  %v224_v58 = vld [vmem:[#allocation5 + $0x3e0] sm:$0xff]  ;;  %v221_v59 = vld [vmem:[#allocation5 + $0x3c8] sm:$0xff]  ;;  %v4654_v62 = vcombine.low %v213_v50, %v217_v51 }
  0x7b   :  { %v225_v60 = vld [vmem:[#allocation5 + $0x3e8] sm:$0xff]  ;;  %v4661_v63 = vcombine.high %v220_v56, %v224_v58  ;;  %v228_v1 = vld [vmem:[#allocation5 + $0x400] sm:$0xff] }
  0x7c   :  { %3186 = vmatpush1.bf16.msra.mxu0 %v4596_v4  ;;  %3350 = vmatpush1.bf16.msra.mxu1 %v4598_v5  ;;  %v4663_v0 = vcombine.high %v221_v59, %v225_v60  ;;  %v232_v2 = vld [vmem:[#allocation5 + $0x420] sm:$0xff]  ;;  %v229_v3 = vld [vmem:[#allocation5 + $0x408] sm:$0xff]  ;;  %v4660_v5 = vcombine.low %v220_v56, %v224_v58 }
  0x7d   :  { %3187 = vmatprep.subr.bf16.mxu0 %v4605_v6  ;;  %3351 = vmatprep.subr.bf16.mxu1 %v4607_v7  ;;  %v233_v4 = vld [vmem:[#allocation5 + $0x428] sm:$0xff]  ;;  %v84_v6 = vld [vmem:[#allocation2] sm:$0xff]  ;;  %v4662_v7 = vcombine.low %v221_v59, %v225_v60  ;;  %v4669_v8 = vcombine.high %v228_v1, %v232_v2  ;;  %v4668_v16 = vcombine.low %v228_v1, %v232_v2 }
  0x7e   :  { %v4671_v9 = vcombine.high %v229_v3, %v233_v4  ;;  %v236_v10 = vld [vmem:[#allocation5 + $0x440] sm:$0xff]  ;;  %v4670_v17 = vcombine.low %v229_v3, %v233_v4  ;;  %v249_v24 = vld [vmem:[#allocation5 + $0x4a8] sm:$0xff] }
  0x7f   :  { %v240_v11 = vld [vmem:[#allocation5 + $0x460] sm:$0xff]  ;;  %v257_v32 = vld [vmem:[#allocation5 + $0x4e8] sm:$0xff] }
  0x80   :  { %3188 = vmatpush1.bf16.msra.mxu0 %v4604_v12  ;;  %3352 = vmatpush1.bf16.msra.mxu1 %v4606_v13  ;;  %v5587_v12 = vpack.c.bf16 %v84_v6, %v84_v6  ;;  %v237_v13 = vld [vmem:[#allocation5 + $0x448] sm:$0xff]  ;;  %v4677_v18 = vcombine.high %v236_v10, %v240_v11  ;;  %v4676_v25 = vcombine.low %v236_v10, %v240_v11  ;;  %v296_v6 = vld [vmem:[#allocation5 + $0x620] sm:$0xff] }
  0x81   :  { %3189 = vmatprep.subr.bf16.mxu0 %v4613_v14  ;;  %3353 = vmatprep.subr.bf16.mxu1 %v4615_v15  ;;  %v241_v14 = vld [vmem:[#allocation5 + $0x468] sm:$0xff]  ;;  %v87_v15 = vld [vmem:[#allocation2 + $0x18] sm:$0xff] }
  0x82   :  { %v4679_v19 = vcombine.high %v237_v13, %v241_v14  ;;  %v4678_v26 = vcombine.low %v237_v13, %v241_v14  ;;  %v265_v40 = vld [vmem:[#allocation5 + $0x528] sm:$0xff]  ;;  %v300_v14 = vld [vmem:[#allocation5 + $0x640] sm:$0xff] }
  0x83   :  { %v273_v48 = vld [vmem:[#allocation5 + $0x568] sm:$0xff] }
  0x84   :  { %3190 = vmatpush1.bf16.msra.mxu0 %v4612_v20  ;;  %3354 = vmatpush1.bf16.msra.mxu1 %v4614_v21  ;;  %v244_v20 = vld [vmem:[#allocation5 + $0x480] sm:$0xff]  ;;  %v281_v56 = vld [vmem:[#allocation5 + $0x5a8] sm:$0xff] }
  0x85   :  { %3191 = vmatprep.subr.bf16.mxu0 %v4621_v22  ;;  %3355 = vmatprep.subr.bf16.mxu1 %v4623_v23  ;;  %v248_v21 = vld [vmem:[#allocation5 + $0x4a0] sm:$0xff]  ;;  %v245_v22 = vld [vmem:[#allocation5 + $0x488] sm:$0xff]  ;;  %v5589_v23 = vpack.c.bf16 %v87_v15, %v87_v15 }
  0x86   :  { %v4685_v27 = vcombine.high %v244_v20, %v248_v21  ;;  %v4684_v33 = vcombine.low %v244_v20, %v248_v21  ;;  %v4686_v34 = vcombine.low %v245_v22, %v249_v24  ;;  %v289_v1 = vld [vmem:[#allocation5 + $0x5e8] sm:$0xff]  ;;  %v304_v15 = vld [vmem:[#allocation5 + $0x660] sm:$0xff] }
  0x87   :  { %v4741_v21 = vcombine.high %v300_v14, %v304_v15 }
  0x88   :  { %3192 = vmatpush1.bf16.msra.mxu0 %v4620_v28  ;;  %3356 = vmatpush1.bf16.msra.mxu1 %v4622_v29  ;;  %v252_v28 = vld [vmem:[#allocation5 + $0x4c0] sm:$0xff] }
  0x89   :  { %3193 = vmatprep.subr.bf16.mxu0 %v4629_v30  ;;  %3357 = vmatprep.subr.bf16.mxu1 %v4631_v31  ;;  %v256_v29 = vld [vmem:[#allocation5 + $0x4e0] sm:$0xff]  ;;  %v253_v30 = vld [vmem:[#allocation5 + $0x4c8] sm:$0xff]  ;;  %v4687_v31 = vcombine.high %v245_v22, %v249_v24 }
  0x8a   :  { %v4693_v35 = vcombine.high %v252_v28, %v256_v29  ;;  %v4692_v41 = vcombine.low %v252_v28, %v256_v29  ;;  %v4694_v42 = vcombine.low %v253_v30, %v257_v32  ;;  %v308_v22 = vld [vmem:[#allocation5 + $0x680] sm:$0xff]  ;;  %v4740_v28 = vcombine.low %v300_v14, %v304_v15  ;;  %v86_v15 = vld [vmem:[#allocation2 + $0x10] sm:$0xff] }
  0x8b   :  { %v312_v24 = vld [vmem:[#allocation5 + $0x6a0] sm:$0xff] }
  0x8c   :  { %3194 = vmatpush1.bf16.msra.mxu0 %v4628_v36  ;;  %3358 = vmatpush1.bf16.msra.mxu1 %v4630_v37  ;;  %v260_v36 = vld [vmem:[#allocation5 + $0x500] sm:$0xff] }
  0x8d   :  { %3195 = vmatprep.subr.bf16.mxu0 %v4637_v38  ;;  %3359 = vmatprep.subr.bf16.mxu1 %v4639_v39  ;;  %v264_v37 = vld [vmem:[#allocation5 + $0x520] sm:$0xff]  ;;  %v261_v38 = vld [vmem:[#allocation5 + $0x508] sm:$0xff]  ;;  %v4695_v39 = vcombine.high %v253_v30, %v257_v32  ;;  %v4749_v30 = vcombine.high %v308_v22, %v312_v24 }
  0x8e   :  { %v4701_v43 = vcombine.high %v260_v36, %v264_v37  ;;  %v4700_v49 = vcombine.low %v260_v36, %v264_v37  ;;  %v4702_v50 = vcombine.low %v261_v38, %v265_v40  ;;  %v320_v32 = vld [vmem:[#allocation5 + $0x6e0] sm:$0xff]  ;;  %v4748_v36 = vcombine.low %v308_v22, %v312_v24  ;;  %v369_v22 = vld [vmem:[#allocation5 + $0x868] sm:$0xff] }
  0x8f   :  { %v89_v24 = vld [vmem:[#allocation2 + $0x28] sm:$0xff] }
  0x90   :  { %3196 = vmatpush1.bf16.msra.mxu0 %v4636_v44  ;;  %3360 = vmatpush1.bf16.msra.mxu1 %v4638_v45  ;;  %v268_v44 = vld [vmem:[#allocation5 + $0x540] sm:$0xff] }
  0x91   :  { %3197 = vmatprep.subr.bf16.mxu0 %v4645_v46  ;;  %3361 = vmatprep.subr.bf16.mxu1 %v4647_v47  ;;  %v272_v45 = vld [vmem:[#allocation5 + $0x560] sm:$0xff]  ;;  %v269_v46 = vld [vmem:[#allocation5 + $0x548] sm:$0xff]  ;;  %v4703_v47 = vcombine.high %v261_v38, %v265_v40 }
  0x92   :  { %v4709_v51 = vcombine.high %v268_v44, %v272_v45  ;;  %v4708_v58 = vcombine.low %v268_v44, %v272_v45  ;;  %v4710_v59 = vcombine.low %v269_v46, %v273_v48  ;;  %v328_v40 = vld [vmem:[#allocation5 + $0x720] sm:$0xff] }
  0x94   :  { %3198 = vmatpush1.bf16.msra.mxu0 %v4644_v52  ;;  %3362 = vmatpush1.bf16.msra.mxu1 %v4646_v53  ;;  %v276_v52 = vld [vmem:[#allocation5 + $0x580] sm:$0xff] }
  0x95   :  { %3199 = vmatprep.subr.bf16.mxu0 %v4653_v54  ;;  %3363 = vmatprep.subr.bf16.mxu1 %v4655_v55  ;;  %v280_v53 = vld [vmem:[#allocation5 + $0x5a0] sm:$0xff]  ;;  %v277_v54 = vld [vmem:[#allocation5 + $0x588] sm:$0xff]  ;;  %v4711_v55 = vcombine.high %v269_v46, %v273_v48 }
  0x96   :  { %v4717_v60 = vcombine.high %v276_v52, %v280_v53  ;;  %v4716_v2 = vcombine.low %v276_v52, %v280_v53  ;;  %v4718_v3 = vcombine.low %v277_v54, %v281_v56  ;;  %v336_v48 = vld [vmem:[#allocation5 + $0x760] sm:$0xff] }
  0x98   :  { %3200 = vmatpush1.bf16.msra.mxu0 %v4652_v61  ;;  %3364 = vmatpush1.bf16.msra.mxu1 %v4654_v62  ;;  %v284_v61 = vld [vmem:[#allocation5 + $0x5c0] sm:$0xff] }
  0x99   :  { %3201 = vmatprep.subr.bf16.mxu0 %v4661_v63  ;;  %3365 = vmatprep.subr.bf16.mxu1 %v4663_v0  ;;  %v288_v62 = vld [vmem:[#allocation5 + $0x5e0] sm:$0xff]  ;;  %v285_v63 = vld [vmem:[#allocation5 + $0x5c8] sm:$0xff]  ;;  %v4719_v0 = vcombine.high %v277_v54, %v281_v56 }
  0x9a   :  { %v4725_v4 = vcombine.high %v284_v61, %v288_v62  ;;  %v4724_v10 = vcombine.low %v284_v61, %v288_v62  ;;  %v4726_v11 = vcombine.low %v285_v63, %v289_v1  ;;  %v344_v56 = vld [vmem:[#allocation5 + $0x7a0] sm:$0xff] }
  0x9c   :  { %3202 = vmatpush1.bf16.msra.mxu0 %v4660_v5  ;;  %3366 = vmatpush1.bf16.msra.mxu1 %v4662_v7  ;;  %v292_v5 = vld [vmem:[#allocation5 + $0x600] sm:$0xff]  ;;  %v293_v7 = vld [vmem:[#allocation5 + $0x608] sm:$0xff] }
  0x9d   :  { %3212 = vmatprep.subr.bf16.mxu0 %v4669_v8  ;;  %3376 = vmatprep.subr.bf16.mxu1 %v4671_v9  ;;  %v4727_v8 = vcombine.high %v285_v63, %v289_v1  ;;  %v297_v9 = vld [vmem:[#allocation5 + $0x628] sm:$0xff]  ;;  %v4733_v13 = vcombine.high %v292_v5, %v296_v6  ;;  %v352_v1 = vld [vmem:[#allocation5 + $0x7e0] sm:$0xff] }
  0x9e   :  { %v4734_v20 = vcombine.low %v293_v7, %v297_v9 }
  0x9f   :  { %3204 = vmatmul.mubr.bf16.vlgmr.msra.gmra.mrb[0].mxu0 %v5587_v12  ;;  %3368 = vmatmul.mubr.bf16.vlgmr.msra.gmra.mrb[0].mxu1 %v5587_v12 }
  0xa0   :  { %3213 = vmatpush1.bf16.msra.mxu0 %v4668_v16  ;;  %3377 = vmatpush1.bf16.msra.mxu1 %v4670_v17  ;;  %v301_v16 = vld [vmem:[#allocation5 + $0x648] sm:$0xff]  ;;  %v4735_v17 = vcombine.high %v293_v7, %v297_v9  ;;  %v360_v7 = vld [vmem:[#allocation5 + $0x820] sm:$0xff] }
  0xa1   :  { %3214 = vmatprep.subr.bf16.mxu0 %v4677_v18  ;;  %3378 = vmatprep.subr.bf16.mxu1 %v4679_v19  ;;  %v305_v18 = vld [vmem:[#allocation5 + $0x668] sm:$0xff]  ;;  %v4732_v19 = vcombine.low %v292_v5, %v296_v6  ;;  %v356_v6 = vld [vmem:[#allocation5 + $0x800] sm:$0xff] }
  0xa2   :  { %3244 = vmatprep.mubr.bf16.mxu0 %v5589_v23  ;;  %3408 = vmatprep.mubr.bf16.mxu1 %v5589_v23  ;;  %v4742_v29 = vcombine.low %v301_v16, %v305_v18 }
  0xa4   :  { %3215 = vmatpush1.bf16.msra.mxu0 %v4676_v25  ;;  %3379 = vmatpush1.bf16.msra.mxu1 %v4678_v26  ;;  %v309_v25 = vld [vmem:[#allocation5 + $0x688] sm:$0xff]  ;;  %v4743_v26 = vcombine.high %v301_v16, %v305_v18  ;;  %v364_v18 = vld [vmem:[#allocation5 + $0x840] sm:$0xff] }
  0xa5   :  { %3216 = vmatprep.subr.bf16.mxu0 %v4685_v27  ;;  %3380 = vmatprep.subr.bf16.mxu1 %v4687_v31  ;;  %v313_v27 = vld [vmem:[#allocation5 + $0x6a8] sm:$0xff]  ;;  %v316_v31 = vld [vmem:[#allocation5 + $0x6c0] sm:$0xff] }
  0xa6   :  { %v4750_v37 = vcombine.low %v309_v25, %v313_v27  ;;  %v4757_v38 = vcombine.high %v316_v31, %v320_v32  ;;  %v4756_v44 = vcombine.low %v316_v31, %v320_v32  ;;  %v373_v32 = vld [vmem:[#allocation5 + $0x888] sm:$0xff] }
  0xa8   :  { %3217 = vmatpush1.bf16.msra.mxu0 %v4684_v33  ;;  %3381 = vmatpush1.bf16.msra.mxu1 %v4686_v34  ;;  %v317_v33 = vld [vmem:[#allocation5 + $0x6c8] sm:$0xff]  ;;  %v4751_v34 = vcombine.high %v309_v25, %v313_v27  ;;  %v5595_v25 = vpack.c.bf16 %v86_v15, %v86_v15 }
  0xa9   :  { %3218 = vmatprep.subr.bf16.mxu0 %v4693_v35  ;;  %3382 = vmatprep.subr.bf16.mxu1 %v4695_v39  ;;  %v321_v35 = vld [vmem:[#allocation5 + $0x6e8] sm:$0xff]  ;;  %v324_v39 = vld [vmem:[#allocation5 + $0x700] sm:$0xff] }
  0xaa   :  { %v4758_v45 = vcombine.low %v317_v33, %v321_v35  ;;  %v4765_v46 = vcombine.high %v324_v39, %v328_v40  ;;  %v4764_v52 = vcombine.low %v324_v39, %v328_v40  ;;  %v380_v39 = vld [vmem:[#allocation5 + $0x8c0] sm:$0xff] }
  0xab   :  { %v384_v40 = vld [vmem:[#allocation5 + $0x8e0] sm:$0xff] }
  0xac   :  { %3219 = vmatpush1.bf16.msra.mxu0 %v4692_v41  ;;  %3383 = vmatpush1.bf16.msra.mxu1 %v4694_v42  ;;  %v325_v41 = vld [vmem:[#allocation5 + $0x708] sm:$0xff]  ;;  %v4759_v42 = vcombine.high %v317_v33, %v321_v35  ;;  %v5597_v33 = vpack.c.bf16 %v89_v24, %v89_v24 }
  0xad   :  { %3220 = vmatprep.subr.bf16.mxu0 %v4701_v43  ;;  %3384 = vmatprep.subr.bf16.mxu1 %v4703_v47  ;;  %v329_v43 = vld [vmem:[#allocation5 + $0x728] sm:$0xff]  ;;  %v332_v47 = vld [vmem:[#allocation5 + $0x740] sm:$0xff] }
  0xae   :  { %v4766_v53 = vcombine.low %v325_v41, %v329_v43  ;;  %v4773_v54 = vcombine.high %v332_v47, %v336_v48  ;;  %v4772_v61 = vcombine.low %v332_v47, %v336_v48  ;;  %v388_v47 = vld [vmem:[#allocation5 + $0x900] sm:$0xff] }
  0xaf   :  { %v392_v48 = vld [vmem:[#allocation5 + $0x920] sm:$0xff] }
  0xb0   :  { %3221 = vmatpush1.bf16.msra.mxu0 %v4700_v49  ;;  %3385 = vmatpush1.bf16.msra.mxu1 %v4702_v50  ;;  %v333_v49 = vld [vmem:[#allocation5 + $0x748] sm:$0xff]  ;;  %v4767_v50 = vcombine.high %v325_v41, %v329_v43 }
  0xb1   :  { %3222 = vmatprep.subr.bf16.mxu0 %v4709_v51  ;;  %3386 = vmatprep.subr.bf16.mxu1 %v4711_v55  ;;  %v337_v51 = vld [vmem:[#allocation5 + $0x768] sm:$0xff]  ;;  %v340_v55 = vld [vmem:[#allocation5 + $0x780] sm:$0xff] }
  0xb2   :  { %v4774_v62 = vcombine.low %v333_v49, %v337_v51  ;;  %v4781_v63 = vcombine.high %v340_v55, %v344_v56  ;;  %v4780_v5 = vcombine.low %v340_v55, %v344_v56  ;;  %v381_v41 = vld [vmem:[#allocation5 + $0x8c8] sm:$0xff]  ;;  %v396_v55 = vld [vmem:[#allocation5 + $0x940] sm:$0xff] }
  0xb3   :  { %v400_v56 = vld [vmem:[#allocation5 + $0x960] sm:$0xff] }
  0xb4   :  { %3223 = vmatpush1.bf16.msra.mxu0 %v4708_v58  ;;  %3387 = vmatpush1.bf16.msra.mxu1 %v4710_v59  ;;  %v341_v58 = vld [vmem:[#allocation5 + $0x788] sm:$0xff]  ;;  %v4775_v59 = vcombine.high %v333_v49, %v337_v51  ;;  %v4820_v51 = vcombine.low %v380_v39, %v384_v40 }
  0xb5   :  { %3224 = vmatprep.subr.bf16.mxu0 %v4717_v60  ;;  %3388 = vmatprep.subr.bf16.mxu1 %v4719_v0  ;;  %v345_v60 = vld [vmem:[#allocation5 + $0x7a8] sm:$0xff]  ;;  %v348_v0 = vld [vmem:[#allocation5 + $0x7c0] sm:$0xff] }
  0xb6   :  { %v4789_v9 = vcombine.high %v348_v0, %v352_v1  ;;  %v4788_v14 = vcombine.low %v348_v0, %v352_v1  ;;  %v389_v49 = vld [vmem:[#allocation5 + $0x908] sm:$0xff]  ;;  %v404_v0 = vld [vmem:[#allocation5 + $0x980] sm:$0xff] }
  0xb7   :  { %v408_v1 = vld [vmem:[#allocation5 + $0x9a0] sm:$0xff] }
  0xb8   :  { %3225 = vmatpush1.bf16.msra.mxu0 %v4716_v2  ;;  %3389 = vmatpush1.bf16.msra.mxu1 %v4718_v3  ;;  %v349_v2 = vld [vmem:[#allocation5 + $0x7c8] sm:$0xff]  ;;  %v4783_v3 = vcombine.high %v341_v58, %v345_v60 }
  0xb9   :  { %3226 = vmatprep.subr.bf16.mxu0 %v4725_v4  ;;  %3390 = vmatprep.subr.bf16.mxu1 %v4727_v8  ;;  %v353_v4 = vld [vmem:[#allocation5 + $0x7e8] sm:$0xff]  ;;  %v4782_v8 = vcombine.low %v341_v58, %v345_v60  ;;  %v4828_v60 = vcombine.low %v388_v47, %v392_v48 }
  0xba   :  { %v4790_v16 = vcombine.low %v349_v2, %v353_v4  ;;  %v397_v58 = vld [vmem:[#allocation5 + $0x948] sm:$0xff] }
  0xbc   :  { %3227 = vmatpush1.bf16.msra.mxu0 %v4724_v10  ;;  %3391 = vmatpush1.bf16.msra.mxu1 %v4726_v11  ;;  %v357_v10 = vld [vmem:[#allocation5 + $0x808] sm:$0xff] }
  0xbd   :  { %3228 = vmatprep.subr.bf16.mxu0 %v4733_v13  ;;  %3392 = vmatprep.subr.bf16.mxu1 %v4735_v17  ;;  %v361_v11 = vld [vmem:[#allocation5 + $0x828] sm:$0xff]  ;;  %v4791_v13 = vcombine.high %v349_v2, %v353_v4  ;;  %v4797_v17 = vcombine.high %v356_v6, %v360_v7  ;;  %v4836_v4 = vcombine.low %v396_v55, %v400_v56 }
  0xbe   :  { %v4798_v27 = vcombine.low %v357_v10, %v361_v11  ;;  %v405_v2 = vld [vmem:[#allocation5 + $0x988] sm:$0xff] }
  0xc0   :  { %3229 = vmatpush1.bf16.msra.mxu0 %v4732_v19  ;;  %3393 = vmatpush1.bf16.msra.mxu1 %v4734_v20  ;;  %v368_v19 = vld [vmem:[#allocation5 + $0x860] sm:$0xff]  ;;  %v365_v20 = vld [vmem:[#allocation5 + $0x848] sm:$0xff] }
  0xc1   :  { %3230 = vmatprep.subr.bf16.mxu0 %v4741_v21  ;;  %3394 = vmatprep.subr.bf16.mxu1 %v4743_v26  ;;  %v4799_v21 = vcombine.high %v357_v10, %v361_v11  ;;  %v4796_v26 = vcombine.low %v356_v6, %v360_v7  ;;  %v4807_v31 = vcombine.high %v365_v20, %v369_v22  ;;  %v413_v10 = vld [vmem:[#allocation5 + $0x9c8] sm:$0xff] }
  0xc2   :  { %v4804_v35 = vcombine.low %v364_v18, %v368_v19  ;;  %v4845_v6 = vcombine.high %v404_v0, %v408_v1  ;;  %v417_v11 = vld [vmem:[#allocation5 + $0x9e8] sm:$0xff] }
  0xc4   :  { %3231 = vmatpush1.bf16.msra.mxu0 %v4740_v28  ;;  %3395 = vmatpush1.bf16.msra.mxu1 %v4742_v29  ;;  %v4805_v28 = vcombine.high %v364_v18, %v368_v19  ;;  %v372_v29 = vld [vmem:[#allocation5 + $0x880] sm:$0xff]  ;;  %v421_v19 = vld [vmem:[#allocation5 + $0xa08] sm:$0xff] }
  0xc5   :  { %3232 = vmatprep.subr.bf16.mxu0 %v4749_v30  ;;  %3396 = vmatprep.subr.bf16.mxu1 %v4751_v34  ;;  %v376_v30 = vld [vmem:[#allocation5 + $0x8a0] sm:$0xff]  ;;  %v377_v34 = vld [vmem:[#allocation5 + $0x8a8] sm:$0xff] }
  0xc6   :  { %v4812_v43 = vcombine.low %v372_v29, %v376_v30  ;;  %v424_v18 = vld [vmem:[#allocation5 + $0xa20] sm:$0xff] }
  0xc8   :  { %3233 = vmatpush1.bf16.msra.mxu0 %v4748_v36  ;;  %3397 = vmatpush1.bf16.msra.mxu1 %v4750_v37  ;;  %v4806_v36 = vcombine.low %v365_v20, %v369_v22  ;;  %v4813_v37 = vcombine.high %v372_v29, %v376_v30  ;;  %v425_v20 = vld [vmem:[#allocation5 + $0xa28] sm:$0xff]  ;;  %v4854_v22 = vcombine.low %v413_v10, %v417_v11 }
  0xc9   :  { %3234 = vmatprep.subr.bf16.mxu0 %v4757_v38  ;;  %3398 = vmatprep.subr.bf16.mxu1 %v4759_v42  ;;  %v4815_v38 = vcombine.high %v373_v32, %v377_v34  ;;  %v385_v42 = vld [vmem:[#allocation5 + $0x8e8] sm:$0xff] }
  0xca   :  { %v429_v29 = vld [vmem:[#allocation5 + $0xa48] sm:$0xff] }
  0xcb   :  { %v433_v30 = vld [vmem:[#allocation5 + $0xa68] sm:$0xff] }
  0xcc   :  { %3235 = vmatpush1.bf16.msra.mxu0 %v4756_v44  ;;  %3399 = vmatpush1.bf16.msra.mxu1 %v4758_v45  ;;  %v4814_v44 = vcombine.low %v373_v32, %v377_v34  ;;  %v4821_v45 = vcombine.high %v380_v39, %v384_v40  ;;  %v4862_v32 = vcombine.low %v421_v19, %v425_v20  ;;  %v441_v39 = vld [vmem:[#allocation5 + $0xaa8] sm:$0xff] }
  0xcd   :  { %3236 = vmatprep.subr.bf16.mxu0 %v4765_v46  ;;  %3400 = vmatprep.subr.bf16.mxu1 %v4767_v50  ;;  %v4823_v46 = vcombine.high %v381_v41, %v385_v42  ;;  %v393_v50 = vld [vmem:[#allocation5 + $0x928] sm:$0xff] }
  0xd0   :  { %3237 = vmatpush1.bf16.msra.mxu0 %v4764_v52  ;;  %3401 = vmatpush1.bf16.msra.mxu1 %v4766_v53  ;;  %v4822_v52 = vcombine.low %v381_v41, %v385_v42  ;;  %v4829_v53 = vcombine.high %v388_v47, %v392_v48  ;;  %v4870_v41 = vcombine.low %v429_v29, %v433_v30  ;;  %v449_v47 = vld [vmem:[#allocation5 + $0xae8] sm:$0xff] }
  0xd1   :  { %3238 = vmatprep.subr.bf16.mxu0 %v4773_v54  ;;  %3402 = vmatprep.subr.bf16.mxu1 %v4775_v59  ;;  %v4831_v54 = vcombine.high %v389_v49, %v393_v50  ;;  %v401_v59 = vld [vmem:[#allocation5 + $0x968] sm:$0xff] }
  0xd4   :  { %3239 = vmatpush1.bf16.msra.mxu0 %v4772_v61  ;;  %3403 = vmatpush1.bf16.msra.mxu1 %v4774_v62  ;;  %v4830_v61 = vcombine.low %v389_v49, %v393_v50  ;;  %v4837_v62 = vcombine.high %v396_v55, %v400_v56  ;;  %v457_v55 = vld [vmem:[#allocation5 + $0xb28] sm:$0xff] }
  0xd5   :  { %3240 = vmatprep.subr.bf16.mxu0 %v4781_v63  ;;  %3404 = vmatprep.subr.bf16.mxu1 %v4783_v3  ;;  %v4839_v63 = vcombine.high %v397_v58, %v401_v59  ;;  %v409_v3 = vld [vmem:[#allocation5 + $0x9a8] sm:$0xff] }
  0xd6   :  { %v4847_v7 = vcombine.high %v405_v2, %v409_v3 }
  0xd8   :  { %3241 = vmatpush1.bf16.msra.mxu0 %v4780_v5  ;;  %3405 = vmatpush1.bf16.msra.mxu1 %v4782_v8  ;;  %v4838_v5 = vcombine.low %v397_v58, %v401_v59  ;;  %v412_v8 = vld [vmem:[#allocation5 + $0x9c0] sm:$0xff] }
  0xd9   :  { %3242 = vmatprep.subr.bf16.mxu0 %v4789_v9  ;;  %3406 = vmatprep.subr.bf16.mxu1 %v4791_v13  ;;  %v416_v9 = vld [vmem:[#allocation5 + $0x9e0] sm:$0xff]  ;;  %v4844_v13 = vcombine.low %v404_v0, %v408_v1  ;;  %v465_v0 = vld [vmem:[#allocation5 + $0xb68] sm:$0xff] }
  0xda   :  { %v4853_v15 = vcombine.high %v412_v8, %v416_v9 }
  0xdc   :  { %3243 = vmatpush1.bf16.msra.mxu0 %v4788_v14  ;;  %3407 = vmatpush1.bf16.msra.mxu1 %v4790_v16  ;;  %v4846_v14 = vcombine.low %v405_v2, %v409_v3  ;;  %v4855_v16 = vcombine.high %v413_v10, %v417_v11 }
  0xdd   :  { %3253 = vmatprep.subr.bf16.mxu0 %v4797_v17  ;;  %3417 = vmatprep.subr.bf16.mxu1 %v4799_v21  ;;  %v420_v17 = vld [vmem:[#allocation5 + $0xa00] sm:$0xff]  ;;  %v4852_v21 = vcombine.low %v412_v8, %v416_v9  ;;  %v473_v8 = vld [vmem:[#allocation5 + $0xba8] sm:$0xff] }
  0xde   :  { %v4861_v24 = vcombine.high %v420_v17, %v424_v18 }
  0xdf   :  { %3245 = vmatmul.mubr.bf16.vlgmr.msra.gmra.mrb[0].mxu0 %v5595_v25  ;;  %3409 = vmatmul.mubr.bf16.vlgmr.msra.gmra.mrb[0].mxu1 %v5595_v25 }
  0xe0   :  { %3254 = vmatpush1.bf16.msra.mxu0 %v4796_v26  ;;  %3418 = vmatpush1.bf16.msra.mxu1 %v4798_v27  ;;  %v4863_v26 = vcombine.high %v421_v19, %v425_v20  ;;  %v428_v27 = vld [vmem:[#allocation5 + $0xa40] sm:$0xff] }
  0xe1   :  { %3255 = vmatprep.subr.bf16.mxu0 %v4805_v28  ;;  %3419 = vmatprep.subr.bf16.mxu1 %v4807_v31  ;;  %v432_v28 = vld [vmem:[#allocation5 + $0xa60] sm:$0xff]  ;;  %v4860_v31 = vcombine.low %v420_v17, %v424_v18  ;;  %v481_v17 = vld [vmem:[#allocation5 + $0xbe8] sm:$0xff] }
  0xe2   :  { %3285 = vmatprep.mubr.bf16.mxu0 %v5597_v33  ;;  %3449 = vmatprep.mubr.bf16.mxu1 %v5597_v33  ;;  %v4869_v34 = vcombine.high %v428_v27, %v432_v28  ;;  %v4868_v40 = vcombine.low %v428_v27, %v432_v28  ;;  %v489_v27 = vld [vmem:[#allocation5 + $0xc28] sm:$0xff] }
  0xe4   :  { %3256 = vmatpush1.bf16.msra.mxu0 %v4804_v35  ;;  %3420 = vmatpush1.bf16.msra.mxu1 %v4806_v36  ;;  %v4871_v35 = vcombine.high %v429_v29, %v433_v30  ;;  %v436_v36 = vld [vmem:[#allocation5 + $0xa80] sm:$0xff] }
  0xe5   :  { %3257 = vmatprep.subr.bf16.mxu0 %v4813_v37  ;;  %3421 = vmatprep.subr.bf16.mxu1 %v4815_v38  ;;  %v440_v37 = vld [vmem:[#allocation5 + $0xaa0] sm:$0xff]  ;;  %v437_v38 = vld [vmem:[#allocation5 + $0xa88] sm:$0xff] }
  0xe6   :  { %v4877_v42 = vcombine.high %v436_v36, %v440_v37  ;;  %v4876_v48 = vcombine.low %v436_v36, %v440_v37  ;;  %v4878_v49 = vcombine.low %v437_v38, %v441_v39  ;;  %v88_v29 = vld [vmem:[#allocation2 + $0x20] sm:$0xff]  ;;  %v493_v37 = vld [vmem:[#allocation5 + $0xc48] sm:$0xff] }
  0xe7   :  { %v5603_v36 = vpack.c.bf16 %v88_v29, %v88_v29 }
  0xe8   :  { %3258 = vmatpush1.bf16.msra.mxu0 %v4812_v43  ;;  %3422 = vmatpush1.bf16.msra.mxu1 %v4814_v44  ;;  %v4879_v43 = vcombine.high %v437_v38, %v441_v39  ;;  %v444_v44 = vld [vmem:[#allocation5 + $0xac0] sm:$0xff]  ;;  %v497_v38 = vld [vmem:[#allocation5 + $0xc68] sm:$0xff]  ;;  %v91_v39 = vld [vmem:[#allocation2 + $0x38] sm:$0xff] }
  0xe9   :  { %3259 = vmatprep.subr.bf16.mxu0 %v4821_v45  ;;  %3423 = vmatprep.subr.bf16.mxu1 %v4823_v46  ;;  %v448_v45 = vld [vmem:[#allocation5 + $0xae0] sm:$0xff]  ;;  %v445_v46 = vld [vmem:[#allocation5 + $0xac8] sm:$0xff] }
  0xea   :  { %v4885_v50 = vcombine.high %v444_v44, %v448_v45  ;;  %v4884_v56 = vcombine.low %v444_v44, %v448_v45  ;;  %v4886_v58 = vcombine.low %v445_v46, %v449_v47  ;;  %v500_v44 = vld [vmem:[#allocation5 + $0xc80] sm:$0xff] }
  0xeb   :  { %v504_v45 = vld [vmem:[#allocation5 + $0xca0] sm:$0xff] }
  0xec   :  { %3260 = vmatpush1.bf16.msra.mxu0 %v4820_v51  ;;  %3424 = vmatpush1.bf16.msra.mxu1 %v4822_v52  ;;  %v4887_v51 = vcombine.high %v445_v46, %v449_v47  ;;  %v452_v52 = vld [vmem:[#allocation5 + $0xb00] sm:$0xff]  ;;  %v5605_v46 = vpack.c.bf16 %v91_v39, %v91_v39  ;;  %v501_v47 = vld [vmem:[#allocation5 + $0xc88] sm:$0xff] }
  0xed   :  { %3261 = vmatprep.subr.bf16.mxu0 %v4829_v53  ;;  %3425 = vmatprep.subr.bf16.mxu1 %v4831_v54  ;;  %v456_v53 = vld [vmem:[#allocation5 + $0xb20] sm:$0xff]  ;;  %v453_v54 = vld [vmem:[#allocation5 + $0xb08] sm:$0xff] }
  0xee   :  { %v4893_v59 = vcombine.high %v452_v52, %v456_v53  ;;  %v4892_v1 = vcombine.low %v452_v52, %v456_v53  ;;  %v4894_v2 = vcombine.low %v453_v54, %v457_v55  ;;  %v508_v53 = vld [vmem:[#allocation5 + $0xcc0] sm:$0xff] }
  0xf0   :  { %3262 = vmatpush1.bf16.msra.mxu0 %v4828_v60  ;;  %3426 = vmatpush1.bf16.msra.mxu1 %v4830_v61  ;;  %v4895_v60 = vcombine.high %v453_v54, %v457_v55  ;;  %v460_v61 = vld [vmem:[#allocation5 + $0xb40] sm:$0xff]  ;;  %v509_v55 = vld [vmem:[#allocation5 + $0xcc8] sm:$0xff] }
  0xf1   :  { %3263 = vmatprep.subr.bf16.mxu0 %v4837_v62  ;;  %3427 = vmatprep.subr.bf16.mxu1 %v4839_v63  ;;  %v464_v62 = vld [vmem:[#allocation5 + $0xb60] sm:$0xff]  ;;  %v461_v63 = vld [vmem:[#allocation5 + $0xb48] sm:$0xff] }
  0xf2   :  { %v4901_v3 = vcombine.high %v460_v61, %v464_v62  ;;  %v4900_v9 = vcombine.low %v460_v61, %v464_v62  ;;  %v4902_v10 = vcombine.low %v461_v63, %v465_v0  ;;  %v512_v54 = vld [vmem:[#allocation5 + $0xce0] sm:$0xff] }
  0xf3   :  { %v516_v62 = vld [vmem:[#allocation5 + $0xd00] sm:$0xff] }
  0xf4   :  { %3264 = vmatpush1.bf16.msra.mxu0 %v4836_v4  ;;  %3428 = vmatpush1.bf16.msra.mxu1 %v4838_v5  ;;  %v4903_v4 = vcombine.high %v461_v63, %v465_v0  ;;  %v468_v5 = vld [vmem:[#allocation5 + $0xb80] sm:$0xff]  ;;  %v517_v0 = vld [vmem:[#allocation5 + $0xd08] sm:$0xff] }
  0xf5   :  { %3265 = vmatprep.subr.bf16.mxu0 %v4845_v6  ;;  %3429 = vmatprep.subr.bf16.mxu1 %v4847_v7  ;;  %v472_v6 = vld [vmem:[#allocation5 + $0xba0] sm:$0xff]  ;;  %v469_v7 = vld [vmem:[#allocation5 + $0xb88] sm:$0xff] }
  0xf6   :  { %v4909_v11 = vcombine.high %v468_v5, %v472_v6  ;;  %v4908_v18 = vcombine.low %v468_v5, %v472_v6  ;;  %v4910_v19 = vcombine.low %v469_v7, %v473_v8  ;;  %v520_v63 = vld [vmem:[#allocation5 + $0xd20] sm:$0xff] }
  0xf7   :  { %v524_v6 = vld [vmem:[#allocation5 + $0xd40] sm:$0xff] }
  0xf8   :  { %3266 = vmatpush1.bf16.msra.mxu0 %v4844_v13  ;;  %3430 = vmatpush1.bf16.msra.mxu1 %v4846_v14  ;;  %v4911_v13 = vcombine.high %v469_v7, %v473_v8  ;;  %v476_v14 = vld [vmem:[#allocation5 + $0xbc0] sm:$0xff]  ;;  %v525_v8 = vld [vmem:[#allocation5 + $0xd48] sm:$0xff] }
  0xf9   :  { %3267 = vmatprep.subr.bf16.mxu0 %v4853_v15  ;;  %3431 = vmatprep.subr.bf16.mxu1 %v4855_v16  ;;  %v480_v15 = vld [vmem:[#allocation5 + $0xbe0] sm:$0xff]  ;;  %v477_v16 = vld [vmem:[#allocation5 + $0xbc8] sm:$0xff] }
  0xfa   :  { %v4917_v20 = vcombine.high %v476_v14, %v480_v15  ;;  %v4916_v28 = vcombine.low %v476_v14, %v480_v15  ;;  %v4918_v30 = vcombine.low %v477_v16, %v481_v17  ;;  %v528_v7 = vld [vmem:[#allocation5 + $0xd60] sm:$0xff] }
  0xfb   :  { %v532_v15 = vld [vmem:[#allocation5 + $0xd80] sm:$0xff] }
  0xfc   :  { %3268 = vmatpush1.bf16.msra.mxu0 %v4852_v21  ;;  %3432 = vmatpush1.bf16.msra.mxu1 %v4854_v22  ;;  %v4919_v21 = vcombine.high %v477_v16, %v481_v17  ;;  %v484_v22 = vld [vmem:[#allocation5 + $0xc00] sm:$0xff]  ;;  %v533_v17 = vld [vmem:[#allocation5 + $0xd88] sm:$0xff] }
  0xfd   :  { %3269 = vmatprep.subr.bf16.mxu0 %v4861_v24  ;;  %3433 = vmatprep.subr.bf16.mxu1 %v4863_v26  ;;  %v488_v24 = vld [vmem:[#allocation5 + $0xc20] sm:$0xff]  ;;  %v485_v26 = vld [vmem:[#allocation5 + $0xc08] sm:$0xff] }
  0xfe   :  { %v536_v16 = vld [vmem:[#allocation5 + $0xda0] sm:$0xff] }
  0xff   :  { %v4972_v29 = vcombine.low %v532_v15, %v536_v16 }
 0x100   :  { %3270 = vmatpush1.bf16.msra.mxu0 %v4860_v31  ;;  %3434 = vmatpush1.bf16.msra.mxu1 %v4862_v32  ;;  %v4925_v31 = vcombine.high %v484_v22, %v488_v24  ;;  %v4927_v32 = vcombine.high %v485_v26, %v489_v27 }
 0x101   :  { %3271 = vmatprep.subr.bf16.mxu0 %v4869_v34  ;;  %3435 = vmatprep.subr.bf16.mxu1 %v4871_v35  ;;  %v492_v34 = vld [vmem:[#allocation5 + $0xc40] sm:$0xff] }
 0x102   :  { %v496_v35 = vld [vmem:[#allocation5 + $0xc60] sm:$0xff] }
 0x104   :  { %3272 = vmatpush1.bf16.msra.mxu0 %v4868_v40  ;;  %3436 = vmatpush1.bf16.msra.mxu1 %v4870_v41  ;;  %v4924_v40 = vcombine.low %v484_v22, %v488_v24  ;;  %v4926_v41 = vcombine.low %v485_v26, %v489_v27  ;;  %v540_v24 = vld [vmem:[#allocation5 + $0xdc0] sm:$0xff]  ;;  %v541_v27 = vld [vmem:[#allocation5 + $0xdc8] sm:$0xff] }
 0x105   :  { %3273 = vmatprep.subr.bf16.mxu0 %v4877_v42  ;;  %3437 = vmatprep.subr.bf16.mxu1 %v4879_v43  ;;  %v4933_v42 = vcombine.high %v492_v34, %v496_v35  ;;  %v4935_v43 = vcombine.high %v493_v37, %v497_v38  ;;  %v544_v26 = vld [vmem:[#allocation5 + $0xde0] sm:$0xff] }
 0x106   :  { %v4980_v39 = vcombine.low %v540_v24, %v544_v26 }
 0x108   :  { %3274 = vmatpush1.bf16.msra.mxu0 %v4876_v48  ;;  %3438 = vmatpush1.bf16.msra.mxu1 %v4878_v49  ;;  %v505_v48 = vld [vmem:[#allocation5 + $0xca8] sm:$0xff]  ;;  %v4932_v49 = vcombine.low %v492_v34, %v496_v35  ;;  %v548_v34 = vld [vmem:[#allocation5 + $0xe00] sm:$0xff] }
 0x109   :  { %3275 = vmatprep.subr.bf16.mxu0 %v4885_v50  ;;  %3439 = vmatprep.subr.bf16.mxu1 %v4887_v51  ;;  %v4934_v50 = vcombine.low %v493_v37, %v497_v38  ;;  %v4941_v51 = vcombine.high %v500_v44, %v504_v45  ;;  %v4943_v52 = vcombine.high %v501_v47, %v505_v48  ;;  %v552_v35 = vld [vmem:[#allocation5 + $0xe20] sm:$0xff]  ;;  %v549_v37 = vld [vmem:[#allocation5 + $0xe08] sm:$0xff] }
 0x10a   :  { %v553_v38 = vld [vmem:[#allocation5 + $0xe28] sm:$0xff] }
 0x10c   :  { %3276 = vmatpush1.bf16.msra.mxu0 %v4884_v56  ;;  %3440 = vmatpush1.bf16.msra.mxu1 %v4886_v58  ;;  %v513_v56 = vld [vmem:[#allocation5 + $0xce8] sm:$0xff]  ;;  %v4940_v58 = vcombine.low %v500_v44, %v504_v45  ;;  %v560_v44 = vld [vmem:[#allocation5 + $0xe60] sm:$0xff] }
 0x10d   :  { %3277 = vmatprep.subr.bf16.mxu0 %v4893_v59  ;;  %3441 = vmatprep.subr.bf16.mxu1 %v4895_v60  ;;  %v4942_v59 = vcombine.low %v501_v47, %v505_v48  ;;  %v4949_v60 = vcombine.high %v508_v53, %v512_v54  ;;  %v4951_v61 = vcombine.high %v509_v55, %v513_v56  ;;  %v557_v45 = vld [vmem:[#allocation5 + $0xe48] sm:$0xff] }
 0x10e   :  { %v561_v47 = vld [vmem:[#allocation5 + $0xe68] sm:$0xff]  ;;  %v4988_v48 = vcombine.low %v548_v34, %v552_v35 }
 0x110   :  { %3278 = vmatpush1.bf16.msra.mxu0 %v4892_v1  ;;  %3442 = vmatpush1.bf16.msra.mxu1 %v4894_v2  ;;  %v521_v1 = vld [vmem:[#allocation5 + $0xd28] sm:$0xff]  ;;  %v4948_v2 = vcombine.low %v508_v53, %v512_v54  ;;  %v568_v53 = vld [vmem:[#allocation5 + $0xea0] sm:$0xff] }
 0x111   :  { %3279 = vmatprep.subr.bf16.mxu0 %v4901_v3  ;;  %3443 = vmatprep.subr.bf16.mxu1 %v4903_v4  ;;  %v4950_v3 = vcombine.low %v509_v55, %v513_v56  ;;  %v4957_v4 = vcombine.high %v516_v62, %v520_v63  ;;  %v4959_v5 = vcombine.high %v517_v0, %v521_v1  ;;  %v565_v54 = vld [vmem:[#allocation5 + $0xe88] sm:$0xff] }
 0x112   :  { %v569_v55 = vld [vmem:[#allocation5 + $0xea8] sm:$0xff] }
 0x114   :  { %3280 = vmatpush1.bf16.msra.mxu0 %v4900_v9  ;;  %3444 = vmatpush1.bf16.msra.mxu1 %v4902_v10  ;;  %v529_v9 = vld [vmem:[#allocation5 + $0xd68] sm:$0xff]  ;;  %v4956_v10 = vcombine.low %v516_v62, %v520_v63  ;;  %v576_v62 = vld [vmem:[#allocation5 + $0xee0] sm:$0xff] }
 0x115   :  { %3281 = vmatprep.subr.bf16.mxu0 %v4909_v11  ;;  %3445 = vmatprep.subr.bf16.mxu1 %v4911_v13  ;;  %v4958_v11 = vcombine.low %v517_v0, %v521_v1  ;;  %v4965_v13 = vcombine.high %v524_v6, %v528_v7  ;;  %v4967_v14 = vcombine.high %v525_v8, %v529_v9  ;;  %v573_v63 = vld [vmem:[#allocation5 + $0xec8] sm:$0xff] }
 0x116   :  { %v577_v0 = vld [vmem:[#allocation5 + $0xee8] sm:$0xff] }
 0x118   :  { %3282 = vmatpush1.bf16.msra.mxu0 %v4908_v18  ;;  %3446 = vmatpush1.bf16.msra.mxu1 %v4910_v19  ;;  %v537_v18 = vld [vmem:[#allocation5 + $0xda8] sm:$0xff]  ;;  %v4964_v19 = vcombine.low %v524_v6, %v528_v7  ;;  %v584_v6 = vld [vmem:[#allocation5 + $0xf20] sm:$0xff] }
 0x119   :  { %3283 = vmatprep.subr.bf16.mxu0 %v4917_v20  ;;  %3447 = vmatprep.subr.bf16.mxu1 %v4919_v21  ;;  %v4966_v20 = vcombine.low %v525_v8, %v529_v9  ;;  %v4973_v21 = vcombine.high %v532_v15, %v536_v16  ;;  %v4975_v22 = vcombine.high %v533_v17, %v537_v18  ;;  %v581_v7 = vld [vmem:[#allocation5 + $0xf08] sm:$0xff]  ;;  %v592_v15 = vld [vmem:[#allocation5 + $0xf60] sm:$0xff] }
 0x11a   :  { %v585_v8 = vld [vmem:[#allocation5 + $0xf28] sm:$0xff] }
 0x11b   :  { %v589_v16 = vld [vmem:[#allocation5 + $0xf48] sm:$0xff] }
 0x11c   :  { %3284 = vmatpush1.bf16.msra.mxu0 %v4916_v28  ;;  %3448 = vmatpush1.bf16.msra.mxu1 %v4918_v30  ;;  %v545_v28 = vld [vmem:[#allocation5 + $0xde8] sm:$0xff]  ;;  %v4974_v30 = vcombine.low %v533_v17, %v537_v18 }
 0x11d   :  { %3294 = vmatprep.subr.bf16.mxu0 %v4925_v31  ;;  %3458 = vmatprep.subr.bf16.mxu1 %v4927_v32  ;;  %v4981_v31 = vcombine.high %v540_v24, %v544_v26  ;;  %v4983_v32 = vcombine.high %v541_v27, %v545_v28  ;;  %v593_v17 = vld [vmem:[#allocation5 + $0xf68] sm:$0xff] }
 0x11e   :  { %v597_v24 = vld [vmem:[#allocation5 + $0xf88] sm:$0xff] }
 0x11f   :  { %3286 = vmatmul.mubr.bf16.vlgmr.msra.gmra.mrb[0].mxu0 %v5603_v36  ;;  %3450 = vmatmul.mubr.bf16.vlgmr.msra.gmra.mrb[0].mxu1 %v5603_v36 }
 0x120   :  { %3295 = vmatpush1.bf16.msra.mxu0 %v4924_v40  ;;  %3459 = vmatpush1.bf16.msra.mxu1 %v4926_v41  ;;  %v4982_v40 = vcombine.low %v541_v27, %v545_v28  ;;  %v4989_v41 = vcombine.high %v548_v34, %v552_v35  ;;  %v5030_v27 = vcombine.low %v589_v16, %v593_v17  ;;  %v106_v34 = vld [vmem:[#allocation5 + $0x30] sm:$0xff]  ;;  %v103_v35 = vld [vmem:[#allocation5 + $0x18] sm:$0xff] }
 0x121   :  { %3296 = vmatprep.subr.bf16.mxu0 %v4933_v42  ;;  %3460 = vmatprep.subr.bf16.mxu1 %v4935_v43  ;;  %v4991_v42 = vcombine.high %v549_v37, %v553_v38  ;;  %v556_v43 = vld [vmem:[#allocation5 + $0xe40] sm:$0xff] }
 0x122   :  { %5045 = vmatprep.mubr.msk.bf16.mxu0 %vm3142_vm0, %v5605_v46  ;;  %5047 = vmatprep.mubr.msk.bf16.mxu1 %vm3142_vm0, %v5605_v46  ;;  %v4996_v56 = vcombine.low %v556_v43, %v560_v44 }
 0x124   :  { %3297 = vmatpush1.bf16.msra.mxu0 %v4932_v49  ;;  %3461 = vmatpush1.bf16.msra.mxu1 %v4934_v50  ;;  %v4990_v49 = vcombine.low %v549_v37, %v553_v38  ;;  %v4997_v50 = vcombine.high %v556_v43, %v560_v44  ;;  %v107_v37 = vld [vmem:[#allocation5 + $0x38] sm:$0xff]  ;;  %v90_v38 = vld [vmem:[#allocation2 + $0x30] sm:$0xff] }
 0x125   :  { %3298 = vmatprep.subr.bf16.mxu0 %v4941_v51  ;;  %3462 = vmatprep.subr.bf16.mxu1 %v4943_v52  ;;  %v4999_v51 = vcombine.high %v557_v45, %v561_v47  ;;  %v564_v52 = vld [vmem:[#allocation5 + $0xe80] sm:$0xff]  ;;  %v110_v43 = vld [vmem:[#allocation5 + $0x50] sm:$0xff] }
 0x126   :  { %v5004_v1 = vcombine.low %v564_v52, %v568_v53  ;;  %v114_v44 = vld [vmem:[#allocation5 + $0x70] sm:$0xff] }
 0x128   :  { %3299 = vmatpush1.bf16.msra.mxu0 %v4940_v58  ;;  %3463 = vmatpush1.bf16.msra.mxu1 %v4942_v59  ;;  %v4998_v58 = vcombine.low %v557_v45, %v561_v47  ;;  %v5005_v59 = vcombine.high %v564_v52, %v568_v53  ;;  %v5617_v45 = vpack.c.bf16 %v90_v38, %v90_v38  ;;  %v111_v47 = vld [vmem:[#allocation5 + $0x58] sm:$0xff]  ;;  %v118_v53 = vld [vmem:[#allocation5 + $0x90] sm:$0xff] }
 0x129   :  { %3300 = vmatprep.subr.bf16.mxu0 %v4949_v60  ;;  %3464 = vmatprep.subr.bf16.mxu1 %v4951_v61  ;;  %v5007_v60 = vcombine.high %v565_v54, %v569_v55  ;;  %v572_v61 = vld [vmem:[#allocation5 + $0xec0] sm:$0xff] }
 0x12a   :  { %v5012_v9 = vcombine.low %v572_v61, %v576_v62 }
 0x12c   :  { %3301 = vmatpush1.bf16.msra.mxu0 %v4948_v2  ;;  %3465 = vmatpush1.bf16.msra.mxu1 %v4950_v3  ;;  %v5006_v2 = vcombine.low %v565_v54, %v569_v55  ;;  %v5013_v3 = vcombine.high %v572_v61, %v576_v62  ;;  %v122_v54 = vld [vmem:[#allocation5 + $0xb0] sm:$0xff]  ;;  %v119_v55 = vld [vmem:[#allocation5 + $0x98] sm:$0xff] }
 0x12d   :  { %3302 = vmatprep.subr.bf16.mxu0 %v4957_v4  ;;  %3466 = vmatprep.subr.bf16.mxu1 %v4959_v5  ;;  %v5015_v4 = vcombine.high %v573_v63, %v577_v0  ;;  %v580_v5 = vld [vmem:[#allocation5 + $0xf00] sm:$0xff]  ;;  %v126_v62 = vld [vmem:[#allocation5 + $0xd0] sm:$0xff] }
 0x12e   :  { %v5020_v18 = vcombine.low %v580_v5, %v584_v6 }
 0x130   :  { %3303 = vmatpush1.bf16.msra.mxu0 %v4956_v10  ;;  %3467 = vmatpush1.bf16.msra.mxu1 %v4958_v11  ;;  %v5014_v10 = vcombine.low %v573_v63, %v577_v0  ;;  %v5021_v11 = vcombine.high %v580_v5, %v584_v6  ;;  %v130_v63 = vld [vmem:[#allocation5 + $0xf0] sm:$0xff]  ;;  %v127_v0 = vld [vmem:[#allocation5 + $0xd8] sm:$0xff] }
 0x131   :  { %3304 = vmatprep.subr.bf16.mxu0 %v4965_v13  ;;  %3468 = vmatprep.subr.bf16.mxu1 %v4967_v14  ;;  %v5023_v13 = vcombine.high %v581_v7, %v585_v8  ;;  %v588_v14 = vld [vmem:[#allocation5 + $0xf40] sm:$0xff]  ;;  %v134_v6 = vld [vmem:[#allocation5 + $0x110] sm:$0xff] }
 0x132   :  { %v5028_v26 = vcombine.low %v588_v14, %v592_v15 }
 0x134   :  { %3305 = vmatpush1.bf16.msra.mxu0 %v4964_v19  ;;  %3469 = vmatpush1.bf16.msra.mxu1 %v4966_v20  ;;  %v5022_v19 = vcombine.low %v581_v7, %v585_v8  ;;  %v5029_v20 = vcombine.high %v588_v14, %v592_v15  ;;  %v138_v7 = vld [vmem:[#allocation5 + $0x130] sm:$0xff]  ;;  %v135_v8 = vld [vmem:[#allocation5 + $0x118] sm:$0xff] }
 0x135   :  { %3306 = vmatprep.subr.bf16.mxu0 %v4973_v21  ;;  %3470 = vmatprep.subr.bf16.mxu1 %v4975_v22  ;;  %v5031_v21 = vcombine.high %v589_v16, %v593_v17  ;;  %v596_v22 = vld [vmem:[#allocation5 + $0xf80] sm:$0xff]  ;;  %v142_v14 = vld [vmem:[#allocation5 + $0x150] sm:$0xff]  ;;  %v143_v16 = vld [vmem:[#allocation5 + $0x158] sm:$0xff] }
 0x136   :  { %v5037_v28 = vcombine.high %v596_v22, %v596_v22  ;;  %v146_v15 = vld [vmem:[#allocation5 + $0x170] sm:$0xff]  ;;  %v147_v17 = vld [vmem:[#allocation5 + $0x178] sm:$0xff] }
 0x138   :  { %3307 = vmatpush1.bf16.msra.mxu0 %v4972_v29  ;;  %3471 = vmatpush1.bf16.msra.mxu1 %v4974_v30  ;;  %v5036_v29 = vcombine.low %v596_v22, %v596_v22  ;;  %v5039_v30 = vcombine.high %v597_v24, %v597_v24  ;;  %v150_v22 = vld [vmem:[#allocation5 + $0x190] sm:$0xff] }
 0x139   :  { %3308 = vmatprep.subr.bf16.mxu0 %v4981_v31  ;;  %3472 = vmatprep.subr.bf16.mxu1 %v4983_v32  ;;  %v5038_v31 = vcombine.low %v597_v24, %v597_v24  ;;  %v102_v32 = vld [vmem:[#allocation5 + $0x10] sm:$0xff] }
 0x13a   :  { %v154_v24 = vld [vmem:[#allocation5 + $0x1b0] sm:$0xff] }
 0x13b   :  { %v4592_v38 = vcombine.low %v150_v22, %v154_v24 }
 0x13c   :  { %3309 = vmatpush1.bf16.msra.mxu0 %v4980_v39  ;;  %3473 = vmatpush1.bf16.msra.mxu1 %v4982_v40  ;;  %v3148_v39 = vsel %vm3146_vm1, %v5036_v29, 0  ;;  %v4545_v40 = vcombine.high %v102_v32, %v106_v34  ;;  %v4586_v29 = vcombine.low %v143_v16, %v147_v17 }
 0x13d   :  { %3310 = vmatprep.subr.bf16.mxu0 %v4989_v41  ;;  %3474 = vmatprep.subr.bf16.mxu1 %v4991_v42  ;;  %v3154_v41 = vsel %vm3146_vm1, %v5038_v31, 0  ;;  %v4547_v42 = vcombine.high %v103_v35, %v107_v37 }
 0x140   :  { %3311 = vmatpush1.bf16.msra.mxu0 %v4988_v48  ;;  %3475 = vmatpush1.bf16.msra.mxu1 %v4990_v49  ;;  %v115_v48 = vld [vmem:[#allocation5 + $0x78] sm:$0xff]  ;;  %v4544_v49 = vcombine.low %v102_v32, %v106_v34  ;;  %v158_v32 = vld [vmem:[#allocation5 + $0x1d0] sm:$0xff] }
 0x141   :  { %3312 = vmatprep.subr.bf16.mxu0 %v4997_v50  ;;  %3476 = vmatprep.subr.bf16.mxu1 %v4999_v51  ;;  %v4546_v50 = vcombine.low %v103_v35, %v107_v37  ;;  %v4553_v51 = vcombine.high %v110_v43, %v114_v44  ;;  %v4555_v52 = vcombine.high %v111_v47, %v115_v48  ;;  %v162_v34 = vld [vmem:[#allocation5 + $0x1f0] sm:$0xff]  ;;  %v159_v35 = vld [vmem:[#allocation5 + $0x1d8] sm:$0xff] }
 0x142   :  { %v163_v37 = vld [vmem:[#allocation5 + $0x1f8] sm:$0xff] }
 0x144   :  { %3313 = vmatpush1.bf16.msra.mxu0 %v4996_v56  ;;  %3477 = vmatpush1.bf16.msra.mxu1 %v4998_v58  ;;  %v123_v56 = vld [vmem:[#allocation5 + $0xb8] sm:$0xff]  ;;  %v4552_v58 = vcombine.low %v110_v43, %v114_v44  ;;  %v170_v43 = vld [vmem:[#allocation5 + $0x230] sm:$0xff] }
 0x145   :  { %3314 = vmatprep.subr.bf16.mxu0 %v5005_v59  ;;  %3478 = vmatprep.subr.bf16.mxu1 %v5007_v60  ;;  %v4554_v59 = vcombine.low %v111_v47, %v115_v48  ;;  %v4561_v60 = vcombine.high %v118_v53, %v122_v54  ;;  %v4563_v61 = vcombine.high %v119_v55, %v123_v56  ;;  %v167_v44 = vld [vmem:[#allocation5 + $0x218] sm:$0xff] }
 0x146   :  { %v171_v47 = vld [vmem:[#allocation5 + $0x238] sm:$0xff]  ;;  %v4600_v48 = vcombine.low %v158_v32, %v162_v34 }
 0x148   :  { %3315 = vmatpush1.bf16.msra.mxu0 %v5004_v1  ;;  %3479 = vmatpush1.bf16.msra.mxu1 %v5006_v2  ;;  %v131_v1 = vld [vmem:[#allocation5 + $0xf8] sm:$0xff]  ;;  %v4560_v2 = vcombine.low %v118_v53, %v122_v54  ;;  %v178_v53 = vld [vmem:[#allocation5 + $0x270] sm:$0xff] }
 0x149   :  { %3316 = vmatprep.subr.bf16.mxu0 %v5013_v3  ;;  %3480 = vmatprep.subr.bf16.mxu1 %v5015_v4  ;;  %v4562_v3 = vcombine.low %v119_v55, %v123_v56  ;;  %v4569_v4 = vcombine.high %v126_v62, %v130_v63  ;;  %v4571_v5 = vcombine.high %v127_v0, %v131_v1  ;;  %v175_v54 = vld [vmem:[#allocation5 + $0x258] sm:$0xff] }
 0x14a   :  { %v179_v55 = vld [vmem:[#allocation5 + $0x278] sm:$0xff] }
 0x14c   :  { %3317 = vmatpush1.bf16.msra.mxu0 %v5012_v9  ;;  %3481 = vmatpush1.bf16.msra.mxu1 %v5014_v10  ;;  %v139_v9 = vld [vmem:[#allocation5 + $0x138] sm:$0xff]  ;;  %v4568_v10 = vcombine.low %v126_v62, %v130_v63  ;;  %v186_v62 = vld [vmem:[#allocation5 + $0x2b0] sm:$0xff] }
 0x14d   :  { %3318 = vmatprep.subr.bf16.mxu0 %v5021_v11  ;;  %3482 = vmatprep.subr.bf16.mxu1 %v5023_v13  ;;  %v4570_v11 = vcombine.low %v127_v0, %v131_v1  ;;  %v4577_v13 = vcombine.high %v134_v6, %v138_v7  ;;  %v183_v63 = vld [vmem:[#allocation5 + $0x298] sm:$0xff] }
 0x14e   :  { %v187_v0 = vld [vmem:[#allocation5 + $0x2b8] sm:$0xff] }
 0x150   :  { %3319 = vmatpush1.bf16.msra.mxu0 %v5020_v18  ;;  %3483 = vmatpush1.bf16.msra.mxu1 %v5022_v19  ;;  %v4576_v18 = vcombine.low %v134_v6, %v138_v7  ;;  %v4578_v19 = vcombine.low %v135_v8, %v139_v9  ;;  %v194_v6 = vld [vmem:[#allocation5 + $0x2f0] sm:$0xff]  ;;  %v191_v7 = vld [vmem:[#allocation5 + $0x2d8] sm:$0xff] }
 0x151   :  { %3320 = vmatprep.subr.bf16.mxu0 %v5029_v20  ;;  %3484 = vmatprep.subr.bf16.mxu1 %v5031_v21  ;;  %v4585_v20 = vcombine.high %v142_v14, %v146_v15  ;;  %v4587_v21 = vcombine.high %v143_v16, %v147_v17  ;;  %v203_v16 = vld [vmem:[#allocation5 + $0x338] sm:$0xff] }
 0x154   :  { %3321 = vmatpush1.bf16.msra.mxu0 %v5028_v26  ;;  %3485 = vmatpush1.bf16.msra.mxu1 %v5030_v27  ;;  %v151_v26 = vld [vmem:[#allocation5 + $0x198] sm:$0xff] }
 0x155   :  { %5044 = vmatprep.subr.msk.bf16.mxu0 %vm3146_vm1, %v5037_v28  ;;  %5046 = vmatprep.subr.msk.bf16.mxu1 %vm3146_vm1, %v5039_v30  ;;  %v155_v27 = vld [vmem:[#allocation5 + $0x1b8] sm:$0xff]  ;;  %v4584_v28 = vcombine.low %v142_v14, %v146_v15  ;;  %v4593_v30 = vcombine.high %v150_v22, %v154_v24  ;;  %v202_v14 = vld [vmem:[#allocation5 + $0x330] sm:$0xff] }
 0x156   :  { %v4595_v31 = vcombine.high %v151_v26, %v155_v27  ;;  %v199_v15 = vld [vmem:[#allocation5 + $0x318] sm:$0xff]  ;;  %v210_v22 = vld [vmem:[#allocation5 + $0x370] sm:$0xff] }
 0x157   :  { %v207_v24 = vld [vmem:[#allocation5 + $0x358] sm:$0xff] }
 0x158   :  { %3323 = vmatpush1.bf16.msra.mxu0 %v3148_v39  ;;  %3487 = vmatpush1.bf16.msra.mxu1 %v3154_v41  ;;  %v4594_v39 = vcombine.low %v151_v26, %v155_v27  ;;  %v4603_v41 = vcombine.high %v159_v35, %v163_v37  ;;  %v211_v26 = vld [vmem:[#allocation5 + $0x378] sm:$0xff] }
 0x159   :  { %3499 = vmatprep.subr.bf16.mxu0 %v4545_v40  ;;  %3663 = vmatprep.subr.bf16.mxu1 %v4547_v42  ;;  %v4601_v40 = vcombine.high %v158_v32, %v162_v34  ;;  %v166_v42 = vld [vmem:[#allocation5 + $0x210] sm:$0xff]  ;;  %v215_v34 = vld [vmem:[#allocation5 + $0x398] sm:$0xff] }
 0x15a   :  { %v4608_v56 = vcombine.low %v166_v42, %v170_v43  ;;  %v218_v32 = vld [vmem:[#allocation5 + $0x3b0] sm:$0xff] }
 0x15b   :  { %3327 = vmatmul.mubr.bf16.vlgmr.msra.gmra.mrb[0].mxu0 %v5617_v45  ;;  %3491 = vmatmul.mubr.bf16.vlgmr.msra.gmra.mrb[0].mxu1 %v5617_v45 }
 0x15c   :  { %3500 = vmatpush1.bf16.msra.mxu0 %v4544_v49  ;;  %3664 = vmatpush1.bf16.msra.mxu1 %v4546_v50  ;;  %v4602_v49 = vcombine.low %v159_v35, %v163_v37  ;;  %v4609_v50 = vcombine.high %v166_v42, %v170_v43  ;;  %v219_v35 = vld [vmem:[#allocation5 + $0x3b8] sm:$0xff]  ;;  %v226_v42 = vld [vmem:[#allocation5 + $0x3f0] sm:$0xff] }
 0x15d   :  { %3501 = vmatprep.subr.bf16.mxu0 %v4553_v51  ;;  %3665 = vmatprep.subr.bf16.mxu1 %v4555_v52  ;;  %v4611_v51 = vcombine.high %v167_v44, %v171_v47  ;;  %v174_v52 = vld [vmem:[#allocation5 + $0x250] sm:$0xff]  ;;  %v223_v43 = vld [vmem:[#allocation5 + $0x3d8] sm:$0xff] }
 0x15e   :  { %3531 = vmatprep.mubr.bf16.mxu0 %v5583_v57  ;;  %3695 = vmatprep.mubr.bf16.mxu1 %v5583_v57  ;;  %v4579_v57 = vcombine.high %v135_v8, %v139_v9  ;;  %v4616_v1 = vcombine.low %v174_v52, %v178_v53  ;;  %v195_v8 = vld [vmem:[#allocation5 + $0x2f8] sm:$0xff] }
 0x160   :  { %3502 = vmatpush1.bf16.msra.mxu0 %v4552_v58  ;;  %3666 = vmatpush1.bf16.msra.mxu1 %v4554_v59  ;;  %v4610_v58 = vcombine.low %v167_v44, %v171_v47  ;;  %v4617_v59 = vcombine.high %v174_v52, %v178_v53  ;;  %v227_v44 = vld [vmem:[#allocation5 + $0x3f8] sm:$0xff]  ;;  %v234_v52 = vld [vmem:[#allocation5 + $0x430] sm:$0xff] }
 0x161   :  { %3503 = vmatprep.subr.bf16.mxu0 %v4561_v60  ;;  %3667 = vmatprep.subr.bf16.mxu1 %v4563_v61  ;;  %v4619_v60 = vcombine.high %v175_v54, %v179_v55  ;;  %v182_v61 = vld [vmem:[#allocation5 + $0x290] sm:$0xff]  ;;  %v231_v53 = vld [vmem:[#allocation5 + $0x418] sm:$0xff] }
 0x162   :  { %v4624_v9 = vcombine.low %v182_v61, %v186_v62 }
 0x164   :  { %3504 = vmatpush1.bf16.msra.mxu0 %v4560_v2  ;;  %3668 = vmatpush1.bf16.msra.mxu1 %v4562_v3  ;;  %v4618_v2 = vcombine.low %v175_v54, %v179_v55  ;;  %v4625_v3 = vcombine.high %v182_v61, %v186_v62  ;;  %v235_v54 = vld [vmem:[#allocation5 + $0x438] sm:$0xff]  ;;  %v242_v61 = vld [vmem:[#allocation5 + $0x470] sm:$0xff] }
 0x165   :  { %3505 = vmatprep.subr.bf16.mxu0 %v4569_v4  ;;  %3669 = vmatprep.subr.bf16.mxu1 %v4571_v5  ;;  %v4627_v4 = vcombine.high %v183_v63, %v187_v0  ;;  %v190_v5 = vld [vmem:[#allocation5 + $0x2d0] sm:$0xff]  ;;  %v239_v62 = vld [vmem:[#allocation5 + $0x458] sm:$0xff] }
 0x166   :  { %v4632_v17 = vcombine.low %v190_v5, %v194_v6 }
 0x168   :  { %3506 = vmatpush1.bf16.msra.mxu0 %v4568_v10  ;;  %3670 = vmatpush1.bf16.msra.mxu1 %v4570_v11  ;;  %v4626_v10 = vcombine.low %v183_v63, %v187_v0  ;;  %v4633_v11 = vcombine.high %v190_v5, %v194_v6  ;;  %v243_v63 = vld [vmem:[#allocation5 + $0x478] sm:$0xff]  ;;  %v250_v5 = vld [vmem:[#allocation5 + $0x4b0] sm:$0xff] }
 0x169   :  { %3507 = vmatprep.subr.bf16.mxu0 %v4577_v13  ;;  %3671 = vmatprep.subr.bf16.mxu1 %v4579_v57  ;;  %v4635_v13 = vcombine.high %v191_v7, %v195_v8  ;;  %v198_v57 = vld [vmem:[#allocation5 + $0x310] sm:$0xff]  ;;  %v247_v6 = vld [vmem:[#allocation5 + $0x498] sm:$0xff] }
 0x16a   :  { %v4640_v27 = vcombine.low %v198_v57, %v202_v14 }
 0x16c   :  { %3508 = vmatpush1.bf16.msra.mxu0 %v4576_v18  ;;  %3672 = vmatpush1.bf16.msra.mxu1 %v4578_v19  ;;  %v4634_v18 = vcombine.low %v191_v7, %v195_v8  ;;  %v4641_v19 = vcombine.high %v198_v57, %v202_v14  ;;  %v251_v7 = vld [vmem:[#allocation5 + $0x4b8] sm:$0xff]  ;;  %v258_v57 = vld [vmem:[#allocation5 + $0x4f0] sm:$0xff] }
 0x16d   :  { %3509 = vmatprep.subr.bf16.mxu0 %v4585_v20  ;;  %3673 = vmatprep.subr.bf16.mxu1 %v4587_v21  ;;  %v4643_v20 = vcombine.high %v199_v15, %v203_v16  ;;  %v206_v21 = vld [vmem:[#allocation5 + $0x350] sm:$0xff]  ;;  %v255_v14 = vld [vmem:[#allocation5 + $0x4d8] sm:$0xff] }
 0x16e   :  { %v4648_v37 = vcombine.low %v206_v21, %v210_v22 }
 0x170   :  { %3510 = vmatpush1.bf16.msra.mxu0 %v4584_v28  ;;  %3674 = vmatpush1.bf16.msra.mxu1 %v4586_v29  ;;  %v4642_v28 = vcombine.low %v199_v15, %v203_v16  ;;  %v4649_v29 = vcombine.high %v206_v21, %v210_v22  ;;  %v259_v15 = vld [vmem:[#allocation5 + $0x4f8] sm:$0xff] }
 0x171   :  { %3511 = vmatprep.subr.bf16.mxu0 %v4593_v30  ;;  %3675 = vmatprep.subr.bf16.mxu1 %v4595_v31  ;;  %v4651_v30 = vcombine.high %v207_v24, %v211_v26  ;;  %v214_v31 = vld [vmem:[#allocation5 + $0x390] sm:$0xff]  ;;  %v263_v21 = vld [vmem:[#allocation5 + $0x518] sm:$0xff] }
 0x172   :  { %v4656_v47 = vcombine.low %v214_v31, %v218_v32  ;;  %v267_v22 = vld [vmem:[#allocation5 + $0x538] sm:$0xff] }
 0x174   :  { %3512 = vmatpush1.bf16.msra.mxu0 %v4592_v38  ;;  %3676 = vmatpush1.bf16.msra.mxu1 %v4594_v39  ;;  %v4650_v38 = vcombine.low %v207_v24, %v211_v26  ;;  %v4657_v39 = vcombine.high %v214_v31, %v218_v32  ;;  %v4698_v26 = vcombine.low %v255_v14, %v259_v15  ;;  %v275_v31 = vld [vmem:[#allocation5 + $0x578] sm:$0xff] }
 0x175   :  { %3513 = vmatprep.subr.bf16.mxu0 %v4601_v40  ;;  %3677 = vmatprep.subr.bf16.mxu1 %v4603_v41  ;;  %v4659_v40 = vcombine.high %v215_v34, %v219_v35  ;;  %v222_v41 = vld [vmem:[#allocation5 + $0x3d0] sm:$0xff] }
 0x176   :  { %v4664_v55 = vcombine.low %v222_v41, %v226_v42 }
 0x178   :  { %3514 = vmatpush1.bf16.msra.mxu0 %v4600_v48  ;;  %3678 = vmatpush1.bf16.msra.mxu1 %v4602_v49  ;;  %v4658_v48 = vcombine.low %v215_v34, %v219_v35  ;;  %v4665_v49 = vcombine.high %v222_v41, %v226_v42  ;;  %v4706_v34 = vcombine.low %v263_v21, %v267_v22  ;;  %v283_v41 = vld [vmem:[#allocation5 + $0x5b8] sm:$0xff] }
 0x179   :  { %3515 = vmatprep.subr.bf16.mxu0 %v4609_v50  ;;  %3679 = vmatprep.subr.bf16.mxu1 %v4611_v51  ;;  %v4667_v50 = vcombine.high %v223_v43, %v227_v44  ;;  %v230_v51 = vld [vmem:[#allocation5 + $0x410] sm:$0xff] }
 0x17a   :  { %v4672_v0 = vcombine.low %v230_v51, %v234_v52 }
 0x17c   :  { %3516 = vmatpush1.bf16.msra.mxu0 %v4608_v56  ;;  %3680 = vmatpush1.bf16.msra.mxu1 %v4610_v58  ;;  %v4666_v56 = vcombine.low %v223_v43, %v227_v44  ;;  %v4673_v58 = vcombine.high %v230_v51, %v234_v52  ;;  %v291_v51 = vld [vmem:[#allocation5 + $0x5f8] sm:$0xff] }
 0x17d   :  { %3517 = vmatprep.subr.bf16.mxu0 %v4617_v59  ;;  %3681 = vmatprep.subr.bf16.mxu1 %v4619_v60  ;;  %v4675_v59 = vcombine.high %v231_v53, %v235_v54  ;;  %v238_v60 = vld [vmem:[#allocation5 + $0x450] sm:$0xff] }
 0x17e   :  { %v4680_v8 = vcombine.low %v238_v60, %v242_v61 }
 0x180   :  { %3518 = vmatpush1.bf16.msra.mxu0 %v4616_v1  ;;  %3682 = vmatpush1.bf16.msra.mxu1 %v4618_v2  ;;  %v4674_v1 = vcombine.low %v231_v53, %v235_v54  ;;  %v4681_v2 = vcombine.high %v238_v60, %v242_v61  ;;  %v299_v60 = vld [vmem:[#allocation5 + $0x638] sm:$0xff] }
 0x181   :  { %3519 = vmatprep.subr.bf16.mxu0 %v4625_v3  ;;  %3683 = vmatprep.subr.bf16.mxu1 %v4627_v4  ;;  %v4683_v3 = vcombine.high %v239_v62, %v243_v63  ;;  %v246_v4 = vld [vmem:[#allocation5 + $0x490] sm:$0xff] }
 0x182   :  { %v4688_v16 = vcombine.low %v246_v4, %v250_v5 }
 0x184   :  { %3520 = vmatpush1.bf16.msra.mxu0 %v4624_v9  ;;  %3684 = vmatpush1.bf16.msra.mxu1 %v4626_v10  ;;  %v4682_v9 = vcombine.low %v239_v62, %v243_v63  ;;  %v4689_v10 = vcombine.high %v246_v4, %v250_v5  ;;  %v307_v4 = vld [vmem:[#allocation5 + $0x678] sm:$0xff] }
 0x185   :  { %3521 = vmatprep.subr.bf16.mxu0 %v4633_v11  ;;  %3685 = vmatprep.subr.bf16.mxu1 %v4635_v13  ;;  %v4691_v11 = vcombine.high %v247_v6, %v251_v7  ;;  %v254_v13 = vld [vmem:[#allocation5 + $0x4d0] sm:$0xff] }
 0x186   :  { %v4696_v24 = vcombine.low %v254_v13, %v258_v57 }
 0x188   :  { %3522 = vmatpush1.bf16.msra.mxu0 %v4632_v17  ;;  %3686 = vmatpush1.bf16.msra.mxu1 %v4634_v18  ;;  %v4697_v17 = vcombine.high %v254_v13, %v258_v57  ;;  %v4699_v18 = vcombine.high %v255_v14, %v259_v15  ;;  %v315_v13 = vld [vmem:[#allocation5 + $0x6b8] sm:$0xff] }
 0x189   :  { %3523 = vmatprep.subr.bf16.mxu0 %v4641_v19  ;;  %3687 = vmatprep.subr.bf16.mxu1 %v4643_v20  ;;  %v262_v19 = vld [vmem:[#allocation5 + $0x510] sm:$0xff] }
 0x18a   :  { %v266_v20 = vld [vmem:[#allocation5 + $0x530] sm:$0xff] }
 0x18b   :  { %v4704_v32 = vcombine.low %v262_v19, %v266_v20 }
 0x18c   :  { %3524 = vmatpush1.bf16.msra.mxu0 %v4640_v27  ;;  %3688 = vmatpush1.bf16.msra.mxu1 %v4642_v28  ;;  %v4705_v27 = vcombine.high %v262_v19, %v266_v20  ;;  %v270_v28 = vld [vmem:[#allocation5 + $0x550] sm:$0xff]  ;;  %v323_v19 = vld [vmem:[#allocation5 + $0x6f8] sm:$0xff] }
 0x18d   :  { %3525 = vmatprep.subr.bf16.mxu0 %v4649_v29  ;;  %3689 = vmatprep.subr.bf16.mxu1 %v4651_v30  ;;  %v274_v29 = vld [vmem:[#allocation5 + $0x570] sm:$0xff]  ;;  %v271_v30 = vld [vmem:[#allocation5 + $0x558] sm:$0xff] }
 0x18e   :  { %v4713_v35 = vcombine.high %v270_v28, %v274_v29  ;;  %v4712_v42 = vcombine.low %v270_v28, %v274_v29  ;;  %v4714_v43 = vcombine.low %v271_v30, %v275_v31  ;;  %v331_v28 = vld [vmem:[#allocation5 + $0x738] sm:$0xff] }
 0x190   :  { %3526 = vmatpush1.bf16.msra.mxu0 %v4648_v37  ;;  %3690 = vmatpush1.bf16.msra.mxu1 %v4650_v38  ;;  %v4715_v37 = vcombine.high %v271_v30, %v275_v31  ;;  %v278_v38 = vld [vmem:[#allocation5 + $0x590] sm:$0xff] }
 0x191   :  { %3527 = vmatprep.subr.bf16.mxu0 %v4657_v39  ;;  %3691 = vmatprep.subr.bf16.mxu1 %v4659_v40  ;;  %v282_v39 = vld [vmem:[#allocation5 + $0x5b0] sm:$0xff]  ;;  %v279_v40 = vld [vmem:[#allocation5 + $0x598] sm:$0xff] }
 0x192   :  { %v4721_v44 = vcombine.high %v278_v38, %v282_v39  ;;  %v4720_v52 = vcombine.low %v278_v38, %v282_v39  ;;  %v4722_v53 = vcombine.low %v279_v40, %v283_v41  ;;  %v339_v38 = vld [vmem:[#allocation5 + $0x778] sm:$0xff] }
 0x194   :  { %3528 = vmatpush1.bf16.msra.mxu0 %v4656_v47  ;;  %3692 = vmatpush1.bf16.msra.mxu1 %v4658_v48  ;;  %v4723_v47 = vcombine.high %v279_v40, %v283_v41  ;;  %v286_v48 = vld [vmem:[#allocation5 + $0x5d0] sm:$0xff] }
 0x195   :  { %3529 = vmatprep.subr.bf16.mxu0 %v4665_v49  ;;  %3693 = vmatprep.subr.bf16.mxu1 %v4667_v50  ;;  %v290_v49 = vld [vmem:[#allocation5 + $0x5f0] sm:$0xff]  ;;  %v287_v50 = vld [vmem:[#allocation5 + $0x5d8] sm:$0xff] }
 0x196   :  { %v4729_v54 = vcombine.high %v286_v48, %v290_v49  ;;  %v4728_v61 = vcombine.low %v286_v48, %v290_v49  ;;  %v4730_v62 = vcombine.low %v287_v50, %v291_v51  ;;  %v347_v48 = vld [vmem:[#allocation5 + $0x7b8] sm:$0xff] }
 0x198   :  { %3530 = vmatpush1.bf16.msra.mxu0 %v4664_v55  ;;  %3694 = vmatpush1.bf16.msra.mxu1 %v4666_v56  ;;  %v4731_v55 = vcombine.high %v287_v50, %v291_v51  ;;  %v294_v56 = vld [vmem:[#allocation5 + $0x610] sm:$0xff] }
 0x199   :  { %3540 = vmatprep.subr.bf16.mxu0 %v4673_v58  ;;  %3704 = vmatprep.subr.bf16.mxu1 %v4675_v59  ;;  %v298_v58 = vld [vmem:[#allocation5 + $0x630] sm:$0xff]  ;;  %v295_v59 = vld [vmem:[#allocation5 + $0x618] sm:$0xff] }
 0x19a   :  { %v4737_v63 = vcombine.high %v294_v56, %v298_v58  ;;  %v4736_v5 = vcombine.low %v294_v56, %v298_v58  ;;  %v355_v56 = vld [vmem:[#allocation5 + $0x7f8] sm:$0xff] }
 0x19b   :  { %3532 = vmatmul.mubr.bf16.vlgmr.msra.gmra.mrb[4].mxu0 %v5587_v12  ;;  %3696 = vmatmul.mubr.bf16.vlgmr.msra.gmra.mrb[4].mxu1 %v5587_v12  ;;  %v4690_v12 = vcombine.low %v247_v6, %v251_v7  ;;  %v4738_v6 = vcombine.low %v295_v59, %v299_v60 }
 0x19c   :  { %3541 = vmatpush1.bf16.msra.mxu0 %v4672_v0  ;;  %3705 = vmatpush1.bf16.msra.mxu1 %v4674_v1  ;;  %v4739_v0 = vcombine.high %v295_v59, %v299_v60  ;;  %v302_v1 = vld [vmem:[#allocation5 + $0x650] sm:$0xff] }
 0x19d   :  { %3542 = vmatprep.subr.bf16.mxu0 %v4681_v2  ;;  %3706 = vmatprep.subr.bf16.mxu1 %v4683_v3  ;;  %v306_v2 = vld [vmem:[#allocation5 + $0x670] sm:$0xff]  ;;  %v303_v3 = vld [vmem:[#allocation5 + $0x658] sm:$0xff] }
 0x19e   :  { %3572 = vmatprep.mubr.bf16.mxu0 %v5589_v23  ;;  %3736 = vmatprep.mubr.bf16.mxu1 %v5589_v23  ;;  %v4707_v23 = vcombine.high %v263_v21, %v267_v22  ;;  %v4745_v7 = vcombine.high %v302_v1, %v306_v2  ;;  %v4744_v57 = vcombine.low %v302_v1, %v306_v2  ;;  %v363_v1 = vld [vmem:[#allocation5 + $0x838] sm:$0xff] }
 0x19f   :  { %v4746_v14 = vcombine.low %v303_v3, %v307_v4 }
 0x1a0   :  { %3543 = vmatpush1.bf16.msra.mxu0 %v4680_v8  ;;  %3707 = vmatpush1.bf16.msra.mxu1 %v4682_v9  ;;  %v4747_v8 = vcombine.high %v303_v3, %v307_v4  ;;  %v310_v9 = vld [vmem:[#allocation5 + $0x690] sm:$0xff] }
 0x1a1   :  { %3544 = vmatprep.subr.bf16.mxu0 %v4689_v10  ;;  %3708 = vmatprep.subr.bf16.mxu1 %v4691_v11  ;;  %v314_v10 = vld [vmem:[#allocation5 + $0x6b0] sm:$0xff]  ;;  %v311_v11 = vld [vmem:[#allocation5 + $0x698] sm:$0xff] }
 0x1a2   :  { %v4753_v15 = vcombine.high %v310_v9, %v314_v10  ;;  %v4752_v20 = vcombine.low %v310_v9, %v314_v10  ;;  %v4754_v21 = vcombine.low %v311_v11, %v315_v13  ;;  %v371_v9 = vld [vmem:[#allocation5 + $0x878] sm:$0xff] }
 0x1a4   :  { %3545 = vmatpush1.bf16.msra.mxu0 %v4688_v16  ;;  %3709 = vmatpush1.bf16.msra.mxu1 %v4690_v12  ;;  %v4755_v16 = vcombine.high %v311_v11, %v315_v13  ;;  %v318_v12 = vld [vmem:[#allocation5 + $0x6d0] sm:$0xff] }
 0x1a5   :  { %3546 = vmatprep.subr.bf16.mxu0 %v4697_v17  ;;  %3710 = vmatprep.subr.bf16.mxu1 %v4699_v18  ;;  %v322_v17 = vld [vmem:[#allocation5 + $0x6f0] sm:$0xff]  ;;  %v319_v18 = vld [vmem:[#allocation5 + $0x6d8] sm:$0xff] }
 0x1a6   :  { %v4761_v22 = vcombine.high %v318_v12, %v322_v17  ;;  %v4760_v29 = vcombine.low %v318_v12, %v322_v17  ;;  %v4762_v30 = vcombine.low %v319_v18, %v323_v19  ;;  %v379_v12 = vld [vmem:[#allocation5 + $0x8b8] sm:$0xff] }
 0x1a8   :  { %3547 = vmatpush1.bf16.msra.mxu0 %v4696_v24  ;;  %3711 = vmatpush1.bf16.msra.mxu1 %v4698_v26  ;;  %v4763_v24 = vcombine.high %v319_v18, %v323_v19  ;;  %v326_v26 = vld [vmem:[#allocation5 + $0x710] sm:$0xff] }
 0x1a9   :  { %3548 = vmatprep.subr.bf16.mxu0 %v4705_v27  ;;  %3712 = vmatprep.subr.bf16.mxu1 %v4707_v23  ;;  %v330_v27 = vld [vmem:[#allocation5 + $0x730] sm:$0xff]  ;;  %v327_v23 = vld [vmem:[#allocation5 + $0x718] sm:$0xff] }
 0x1aa   :  { %v4769_v31 = vcombine.high %v326_v26, %v330_v27  ;;  %v4768_v39 = vcombine.low %v326_v26, %v330_v27  ;;  %v4770_v40 = vcombine.low %v327_v23, %v331_v28  ;;  %v387_v26 = vld [vmem:[#allocation5 + $0x8f8] sm:$0xff] }
 0x1ac   :  { %3549 = vmatpush1.bf16.msra.mxu0 %v4704_v32  ;;  %3713 = vmatpush1.bf16.msra.mxu1 %v4706_v34  ;;  %v4771_v32 = vcombine.high %v327_v23, %v331_v28  ;;  %v334_v34 = vld [vmem:[#allocation5 + $0x750] sm:$0xff] }
 0x1ad   :  { %3550 = vmatprep.subr.bf16.mxu0 %v4713_v35  ;;  %3714 = vmatprep.subr.bf16.mxu1 %v4715_v37  ;;  %v338_v35 = vld [vmem:[#allocation5 + $0x770] sm:$0xff]  ;;  %v335_v37 = vld [vmem:[#allocation5 + $0x758] sm:$0xff] }
 0x1ae   :  { %v4777_v41 = vcombine.high %v334_v34, %v338_v35  ;;  %v4776_v49 = vcombine.low %v334_v34, %v338_v35  ;;  %v4778_v50 = vcombine.low %v335_v37, %v339_v38 }
 0x1b0   :  { %3551 = vmatpush1.bf16.msra.mxu0 %v4712_v42  ;;  %3715 = vmatpush1.bf16.msra.mxu1 %v4714_v43  ;;  %v4779_v42 = vcombine.high %v335_v37, %v339_v38  ;;  %v342_v43 = vld [vmem:[#allocation5 + $0x790] sm:$0xff] }
 0x1b1   :  { %3552 = vmatprep.subr.bf16.mxu0 %v4721_v44  ;;  %3716 = vmatprep.subr.bf16.mxu1 %v4723_v47  ;;  %v346_v44 = vld [vmem:[#allocation5 + $0x7b0] sm:$0xff]  ;;  %v343_v47 = vld [vmem:[#allocation5 + $0x798] sm:$0xff] }
 0x1b2   :  { %v4785_v51 = vcombine.high %v342_v43, %v346_v44  ;;  %v4784_v58 = vcombine.low %v342_v43, %v346_v44  ;;  %v4786_v59 = vcombine.low %v343_v47, %v347_v48  ;;  %v398_v38 = vld [vmem:[#allocation5 + $0x950] sm:$0xff] }
 0x1b4   :  { %3553 = vmatpush1.bf16.msra.mxu0 %v4720_v52  ;;  %3717 = vmatpush1.bf16.msra.mxu1 %v4722_v53  ;;  %v4787_v52 = vcombine.high %v343_v47, %v347_v48  ;;  %v350_v53 = vld [vmem:[#allocation5 + $0x7d0] sm:$0xff] }
 0x1b5   :  { %3554 = vmatprep.subr.bf16.mxu0 %v4729_v54  ;;  %3718 = vmatprep.subr.bf16.mxu1 %v4731_v55  ;;  %v354_v54 = vld [vmem:[#allocation5 + $0x7f0] sm:$0xff]  ;;  %v351_v55 = vld [vmem:[#allocation5 + $0x7d8] sm:$0xff] }
 0x1b6   :  { %v4793_v60 = vcombine.high %v350_v53, %v354_v54  ;;  %v4792_v2 = vcombine.low %v350_v53, %v354_v54  ;;  %v4794_v3 = vcombine.low %v351_v55, %v355_v56  ;;  %v406_v48 = vld [vmem:[#allocation5 + $0x990] sm:$0xff] }
 0x1b8   :  { %3555 = vmatpush1.bf16.msra.mxu0 %v4728_v61  ;;  %3719 = vmatpush1.bf16.msra.mxu1 %v4730_v62  ;;  %v4795_v61 = vcombine.high %v351_v55, %v355_v56  ;;  %v358_v62 = vld [vmem:[#allocation5 + $0x810] sm:$0xff] }
 0x1b9   :  { %3556 = vmatprep.subr.bf16.mxu0 %v4737_v63  ;;  %3720 = vmatprep.subr.bf16.mxu1 %v4739_v0  ;;  %v362_v63 = vld [vmem:[#allocation5 + $0x830] sm:$0xff]  ;;  %v359_v0 = vld [vmem:[#allocation5 + $0x818] sm:$0xff] }
 0x1ba   :  { %v4801_v4 = vcombine.high %v358_v62, %v362_v63  ;;  %v4800_v10 = vcombine.low %v358_v62, %v362_v63  ;;  %v4802_v11 = vcombine.low %v359_v0, %v363_v1  ;;  %v414_v56 = vld [vmem:[#allocation5 + $0x9d0] sm:$0xff] }
 0x1bc   :  { %3557 = vmatpush1.bf16.msra.mxu0 %v4736_v5  ;;  %3721 = vmatpush1.bf16.msra.mxu1 %v4738_v6  ;;  %v4803_v5 = vcombine.high %v359_v0, %v363_v1  ;;  %v366_v6 = vld [vmem:[#allocation5 + $0x850] sm:$0xff] }
 0x1bd   :  { %3558 = vmatprep.subr.bf16.mxu0 %v4745_v7  ;;  %3722 = vmatprep.subr.bf16.mxu1 %v4747_v8  ;;  %v370_v7 = vld [vmem:[#allocation5 + $0x870] sm:$0xff]  ;;  %v367_v8 = vld [vmem:[#allocation5 + $0x858] sm:$0xff] }
 0x1be   :  { %v4809_v13 = vcombine.high %v366_v6, %v370_v7  ;;  %v4808_v17 = vcombine.low %v366_v6, %v370_v7  ;;  %v4810_v18 = vcombine.low %v367_v8, %v371_v9  ;;  %v422_v1 = vld [vmem:[#allocation5 + $0xa10] sm:$0xff] }
 0x1c0   :  { %3559 = vmatpush1.bf16.msra.mxu0 %v4744_v57  ;;  %3723 = vmatpush1.bf16.msra.mxu1 %v4746_v14  ;;  %v4811_v57 = vcombine.high %v367_v8, %v371_v9  ;;  %v374_v14 = vld [vmem:[#allocation5 + $0x890] sm:$0xff] }
 0x1c1   :  { %3560 = vmatprep.subr.bf16.mxu0 %v4753_v15  ;;  %3724 = vmatprep.subr.bf16.mxu1 %v4755_v16  ;;  %v378_v15 = vld [vmem:[#allocation5 + $0x8b0] sm:$0xff]  ;;  %v375_v16 = vld [vmem:[#allocation5 + $0x898] sm:$0xff] }
 0x1c2   :  { %v4817_v19 = vcombine.high %v374_v14, %v378_v15  ;;  %v4816_v27 = vcombine.low %v374_v14, %v378_v15  ;;  %v430_v9 = vld [vmem:[#allocation5 + $0xa50] sm:$0xff] }
 0x1c4   :  { %3561 = vmatpush1.bf16.msra.mxu0 %v4752_v20  ;;  %3725 = vmatpush1.bf16.msra.mxu1 %v4754_v21  ;;  %v4819_v20 = vcombine.high %v375_v16, %v379_v12  ;;  %v382_v21 = vld [vmem:[#allocation5 + $0x8d0] sm:$0xff] }
 0x1c5   :  { %3562 = vmatprep.subr.bf16.mxu0 %v4761_v22  ;;  %3726 = vmatprep.subr.bf16.mxu1 %v4763_v24  ;;  %v386_v22 = vld [vmem:[#allocation5 + $0x8f0] sm:$0xff]  ;;  %v383_v24 = vld [vmem:[#allocation5 + $0x8d8] sm:$0xff] }
 0x1c6   :  { %v4825_v23 = vcombine.high %v382_v21, %v386_v22  ;;  %v4827_v28 = vcombine.high %v383_v24, %v387_v26  ;;  %v4824_v34 = vcombine.low %v382_v21, %v386_v22  ;;  %v4826_v35 = vcombine.low %v383_v24, %v387_v26  ;;  %v446_v26 = vld [vmem:[#allocation5 + $0xad0] sm:$0xff] }
 0x1c8   :  { %3563 = vmatpush1.bf16.msra.mxu0 %v4760_v29  ;;  %3727 = vmatpush1.bf16.msra.mxu1 %v4762_v30  ;;  %v390_v29 = vld [vmem:[#allocation5 + $0x910] sm:$0xff] }
 0x1c9   :  { %3564 = vmatprep.subr.bf16.mxu0 %v4769_v31  ;;  %3728 = vmatprep.subr.bf16.mxu1 %v4771_v32  ;;  %v394_v30 = vld [vmem:[#allocation5 + $0x930] sm:$0xff]  ;;  %v391_v31 = vld [vmem:[#allocation5 + $0x918] sm:$0xff] }
 0x1ca   :  { %v395_v32 = vld [vmem:[#allocation5 + $0x938] sm:$0xff]  ;;  %v4833_v37 = vcombine.high %v390_v29, %v394_v30 }
 0x1cb   :  { %v4834_v43 = vcombine.low %v391_v31, %v395_v32 }
 0x1cc   :  { %3565 = vmatpush1.bf16.msra.mxu0 %v4768_v39  ;;  %3729 = vmatpush1.bf16.msra.mxu1 %v4770_v40  ;;  %v402_v39 = vld [vmem:[#allocation5 + $0x970] sm:$0xff]  ;;  %v399_v40 = vld [vmem:[#allocation5 + $0x958] sm:$0xff] }
 0x1cd   :  { %3566 = vmatprep.subr.bf16.mxu0 %v4777_v41  ;;  %3730 = vmatprep.subr.bf16.mxu1 %v4779_v42  ;;  %v403_v41 = vld [vmem:[#allocation5 + $0x978] sm:$0xff]  ;;  %v4832_v42 = vcombine.low %v390_v29, %v394_v30  ;;  %v4841_v44 = vcombine.high %v398_v38, %v402_v39 }
 0x1ce   :  { %v4843_v47 = vcombine.high %v399_v40, %v403_v41  ;;  %v4842_v53 = vcombine.low %v399_v40, %v403_v41  ;;  %v462_v41 = vld [vmem:[#allocation5 + $0xb50] sm:$0xff] }
 0x1d0   :  { %3567 = vmatpush1.bf16.msra.mxu0 %v4776_v49  ;;  %3731 = vmatpush1.bf16.msra.mxu1 %v4778_v50  ;;  %v410_v49 = vld [vmem:[#allocation5 + $0x9b0] sm:$0xff]  ;;  %v407_v50 = vld [vmem:[#allocation5 + $0x998] sm:$0xff] }
 0x1d1   :  { %3568 = vmatprep.subr.bf16.mxu0 %v4785_v51  ;;  %3732 = vmatprep.subr.bf16.mxu1 %v4787_v52  ;;  %v411_v51 = vld [vmem:[#allocation5 + $0x9b8] sm:$0xff]  ;;  %v4840_v52 = vcombine.low %v398_v38, %v402_v39  ;;  %v4849_v54 = vcombine.high %v406_v48, %v410_v49 }
 0x1d2   :  { %v4851_v55 = vcombine.high %v407_v50, %v411_v51  ;;  %v4850_v62 = vcombine.low %v407_v50, %v411_v51  ;;  %v470_v51 = vld [vmem:[#allocation5 + $0xb90] sm:$0xff] }
 0x1d4   :  { %3569 = vmatpush1.bf16.msra.mxu0 %v4784_v58  ;;  %3733 = vmatpush1.bf16.msra.mxu1 %v4786_v59  ;;  %v418_v58 = vld [vmem:[#allocation5 + $0x9f0] sm:$0xff]  ;;  %v415_v59 = vld [vmem:[#allocation5 + $0x9d8] sm:$0xff] }
 0x1d5   :  { %3570 = vmatprep.subr.bf16.mxu0 %v4793_v60  ;;  %3734 = vmatprep.subr.bf16.mxu1 %v4795_v61  ;;  %v419_v60 = vld [vmem:[#allocation5 + $0x9f8] sm:$0xff]  ;;  %v4848_v61 = vcombine.low %v406_v48, %v410_v49  ;;  %v4857_v63 = vcombine.high %v414_v56, %v418_v58 }
 0x1d6   :  { %v4859_v0 = vcombine.high %v415_v59, %v419_v60  ;;  %v4858_v6 = vcombine.low %v415_v59, %v419_v60  ;;  %v478_v60 = vld [vmem:[#allocation5 + $0xbd0] sm:$0xff] }
 0x1d8   :  { %3571 = vmatpush1.bf16.msra.mxu0 %v4792_v2  ;;  %3735 = vmatpush1.bf16.msra.mxu1 %v4794_v3  ;;  %v426_v2 = vld [vmem:[#allocation5 + $0xa30] sm:$0xff]  ;;  %v423_v3 = vld [vmem:[#allocation5 + $0xa18] sm:$0xff] }
 0x1d9   :  { %3581 = vmatprep.subr.bf16.mxu0 %v4801_v4  ;;  %3745 = vmatprep.subr.bf16.mxu1 %v4803_v5  ;;  %v427_v4 = vld [vmem:[#allocation5 + $0xa38] sm:$0xff]  ;;  %v4856_v5 = vcombine.low %v414_v56, %v418_v58  ;;  %v4865_v7 = vcombine.high %v422_v1, %v426_v2 }
 0x1da   :  { %v4867_v8 = vcombine.high %v423_v3, %v427_v4  ;;  %v4866_v14 = vcombine.low %v423_v3, %v427_v4  ;;  %v486_v4 = vld [vmem:[#allocation5 + $0xc10] sm:$0xff] }
 0x1db   :  { %3573 = vmatmul.mubr.bf16.vlgmr.msra.gmra.mrb[4].mxu0 %v5595_v25  ;;  %3737 = vmatmul.mubr.bf16.vlgmr.msra.gmra.mrb[4].mxu1 %v5595_v25  ;;  %v4818_v25 = vcombine.low %v375_v16, %v379_v12  ;;  %v438_v12 = vld [vmem:[#allocation5 + $0xa90] sm:$0xff] }
 0x1dc   :  { %3582 = vmatpush1.bf16.msra.mxu0 %v4800_v10  ;;  %3746 = vmatpush1.bf16.msra.mxu1 %v4802_v11  ;;  %v434_v10 = vld [vmem:[#allocation5 + $0xa70] sm:$0xff]  ;;  %v431_v11 = vld [vmem:[#allocation5 + $0xa58] sm:$0xff] }
 0x1dd   :  { %3583 = vmatprep.subr.bf16.mxu0 %v4809_v13  ;;  %3747 = vmatprep.subr.bf16.mxu1 %v4811_v57  ;;  %v435_v13 = vld [vmem:[#allocation5 + $0xa78] sm:$0xff]  ;;  %v4864_v57 = vcombine.low %v422_v1, %v426_v2  ;;  %v4873_v15 = vcombine.high %v430_v9, %v434_v10 }
 0x1de   :  { %3613 = vmatprep.mubr.bf16.mxu0 %v5597_v33  ;;  %3777 = vmatprep.mubr.bf16.mxu1 %v5597_v33  ;;  %v4835_v33 = vcombine.high %v391_v31, %v395_v32  ;;  %v4875_v16 = vcombine.high %v431_v11, %v435_v13  ;;  %v4874_v21 = vcombine.low %v431_v11, %v435_v13  ;;  %v454_v32 = vld [vmem:[#allocation5 + $0xb10] sm:$0xff] }
 0x1df   :  { %v494_v13 = vld [vmem:[#allocation5 + $0xc50] sm:$0xff] }
 0x1e0   :  { %3584 = vmatpush1.bf16.msra.mxu0 %v4808_v17  ;;  %3748 = vmatpush1.bf16.msra.mxu1 %v4810_v18  ;;  %v442_v17 = vld [vmem:[#allocation5 + $0xab0] sm:$0xff]  ;;  %v439_v18 = vld [vmem:[#allocation5 + $0xa98] sm:$0xff] }
 0x1e1   :  { %3585 = vmatprep.subr.bf16.mxu0 %v4817_v19  ;;  %3749 = vmatprep.subr.bf16.mxu1 %v4819_v20  ;;  %v443_v19 = vld [vmem:[#allocation5 + $0xab8] sm:$0xff]  ;;  %v4872_v20 = vcombine.low %v430_v9, %v434_v10  ;;  %v4881_v22 = vcombine.high %v438_v12, %v442_v17 }
 0x1e2   :  { %v4883_v24 = vcombine.high %v439_v18, %v443_v19  ;;  %v4882_v29 = vcombine.low %v439_v18, %v443_v19  ;;  %v502_v19 = vld [vmem:[#allocation5 + $0xc90] sm:$0xff] }
 0x1e4   :  { %3586 = vmatpush1.bf16.msra.mxu0 %v4816_v27  ;;  %3750 = vmatpush1.bf16.msra.mxu1 %v4818_v25  ;;  %v450_v27 = vld [vmem:[#allocation5 + $0xaf0] sm:$0xff]  ;;  %v447_v25 = vld [vmem:[#allocation5 + $0xad8] sm:$0xff] }
 0x1e5   :  { %3587 = vmatprep.subr.bf16.mxu0 %v4825_v23  ;;  %3751 = vmatprep.subr.bf16.mxu1 %v4827_v28  ;;  %v451_v23 = vld [vmem:[#allocation5 + $0xaf8] sm:$0xff]  ;;  %v4880_v28 = vcombine.low %v438_v12, %v442_v17  ;;  %v4889_v30 = vcombine.high %v446_v26, %v450_v27 }
 0x1e6   :  { %v4891_v31 = vcombine.high %v447_v25, %v451_v23  ;;  %v4890_v38 = vcombine.low %v447_v25, %v451_v23  ;;  %v510_v23 = vld [vmem:[#allocation5 + $0xcd0] sm:$0xff] }
 0x1e8   :  { %3588 = vmatpush1.bf16.msra.mxu0 %v4824_v34  ;;  %3752 = vmatpush1.bf16.msra.mxu1 %v4826_v35  ;;  %v458_v34 = vld [vmem:[#allocation5 + $0xb30] sm:$0xff]  ;;  %v455_v35 = vld [vmem:[#allocation5 + $0xb18] sm:$0xff] }
 0x1e9   :  { %3589 = vmatprep.subr.bf16.mxu0 %v4833_v37  ;;  %3753 = vmatprep.subr.bf16.mxu1 %v4835_v33  ;;  %v459_v37 = vld [vmem:[#allocation5 + $0xb38] sm:$0xff]  ;;  %v4888_v33 = vcombine.low %v446_v26, %v450_v27  ;;  %v4897_v39 = vcombine.high %v454_v32, %v458_v34 }
 0x1ea   :  { %v4899_v40 = vcombine.high %v455_v35, %v459_v37  ;;  %v4898_v48 = vcombine.low %v455_v35, %v459_v37  ;;  %v518_v35 = vld [vmem:[#allocation5 + $0xd10] sm:$0xff] }
 0x1eb   :  { %v522_v37 = vld [vmem:[#allocation5 + $0xd30] sm:$0xff] }
 0x1ec   :  { %3590 = vmatpush1.bf16.msra.mxu0 %v4832_v42  ;;  %3754 = vmatpush1.bf16.msra.mxu1 %v4834_v43  ;;  %v466_v42 = vld [vmem:[#allocation5 + $0xb70] sm:$0xff]  ;;  %v463_v43 = vld [vmem:[#allocation5 + $0xb58] sm:$0xff] }
 0x1ed   :  { %3591 = vmatprep.subr.bf16.mxu0 %v4841_v44  ;;  %3755 = vmatprep.subr.bf16.mxu1 %v4843_v47  ;;  %v467_v44 = vld [vmem:[#allocation5 + $0xb78] sm:$0xff]  ;;  %v4896_v47 = vcombine.low %v454_v32, %v458_v34  ;;  %v4905_v49 = vcombine.high %v462_v41, %v466_v42 }
 0x1ee   :  { %v4907_v50 = vcombine.high %v463_v43, %v467_v44  ;;  %v4906_v56 = vcombine.low %v463_v43, %v467_v44  ;;  %v530_v43 = vld [vmem:[#allocation5 + $0xd70] sm:$0xff]  ;;  %v527_v44 = vld [vmem:[#allocation5 + $0xd58] sm:$0xff] }
 0x1f0   :  { %3592 = vmatpush1.bf16.msra.mxu0 %v4840_v52  ;;  %3756 = vmatpush1.bf16.msra.mxu1 %v4842_v53  ;;  %v474_v52 = vld [vmem:[#allocation5 + $0xbb0] sm:$0xff]  ;;  %v471_v53 = vld [vmem:[#allocation5 + $0xb98] sm:$0xff] }
 0x1f1   :  { %3593 = vmatprep.subr.bf16.mxu0 %v4849_v54  ;;  %3757 = vmatprep.subr.bf16.mxu1 %v4851_v55  ;;  %v475_v54 = vld [vmem:[#allocation5 + $0xbb8] sm:$0xff]  ;;  %v4904_v55 = vcombine.low %v462_v41, %v466_v42  ;;  %v4913_v58 = vcombine.high %v470_v51, %v474_v52  ;;  %v4961_v41 = vcombine.high %v518_v35, %v522_v37  ;;  %v526_v42 = vld [vmem:[#allocation5 + $0xd50] sm:$0xff] }
 0x1f2   :  { %v4915_v59 = vcombine.high %v471_v53, %v475_v54  ;;  %v4914_v1 = vcombine.low %v471_v53, %v475_v54  ;;  %v538_v53 = vld [vmem:[#allocation5 + $0xdb0] sm:$0xff]  ;;  %v535_v54 = vld [vmem:[#allocation5 + $0xd98] sm:$0xff] }
 0x1f4   :  { %3594 = vmatpush1.bf16.msra.mxu0 %v4848_v61  ;;  %3758 = vmatpush1.bf16.msra.mxu1 %v4850_v62  ;;  %v482_v61 = vld [vmem:[#allocation5 + $0xbf0] sm:$0xff]  ;;  %v479_v62 = vld [vmem:[#allocation5 + $0xbd8] sm:$0xff] }
 0x1f5   :  { %3595 = vmatprep.subr.bf16.mxu0 %v4857_v63  ;;  %3759 = vmatprep.subr.bf16.mxu1 %v4859_v0  ;;  %v483_v63 = vld [vmem:[#allocation5 + $0xbf8] sm:$0xff]  ;;  %v4912_v0 = vcombine.low %v470_v51, %v474_v52  ;;  %v4921_v2 = vcombine.high %v478_v60, %v482_v61  ;;  %v534_v52 = vld [vmem:[#allocation5 + $0xd90] sm:$0xff] }
 0x1f6   :  { %v4923_v3 = vcombine.high %v479_v62, %v483_v63  ;;  %v4922_v9 = vcombine.low %v479_v62, %v483_v63  ;;  %v542_v62 = vld [vmem:[#allocation5 + $0xdd0] sm:$0xff] }
 0x1f7   :  { %v546_v63 = vld [vmem:[#allocation5 + $0xdf0] sm:$0xff] }
 0x1f8   :  { %3596 = vmatpush1.bf16.msra.mxu0 %v4856_v5  ;;  %3760 = vmatpush1.bf16.msra.mxu1 %v4858_v6  ;;  %v490_v5 = vld [vmem:[#allocation5 + $0xc30] sm:$0xff]  ;;  %v487_v6 = vld [vmem:[#allocation5 + $0xc18] sm:$0xff] }
 0x1f9   :  { %3597 = vmatprep.subr.bf16.mxu0 %v4865_v7  ;;  %3761 = vmatprep.subr.bf16.mxu1 %v4867_v8  ;;  %v491_v7 = vld [vmem:[#allocation5 + $0xc38] sm:$0xff]  ;;  %v4920_v8 = vcombine.low %v478_v60, %v482_v61  ;;  %v4929_v10 = vcombine.high %v486_v4, %v490_v5 }
 0x1fa   :  { %v4931_v11 = vcombine.high %v487_v6, %v491_v7  ;;  %v4930_v12 = vcombine.low %v487_v6, %v491_v7  ;;  %v4976_v6 = vcombine.low %v534_v52, %v538_v53 }
 0x1fc   :  { %3598 = vmatpush1.bf16.msra.mxu0 %v4864_v57  ;;  %3762 = vmatpush1.bf16.msra.mxu1 %v4866_v14  ;;  %v498_v57 = vld [vmem:[#allocation5 + $0xc70] sm:$0xff]  ;;  %v495_v14 = vld [vmem:[#allocation5 + $0xc58] sm:$0xff] }
 0x1fd   :  { %3599 = vmatprep.subr.bf16.mxu0 %v4873_v15  ;;  %3763 = vmatprep.subr.bf16.mxu1 %v4875_v16  ;;  %v499_v15 = vld [vmem:[#allocation5 + $0xc78] sm:$0xff]  ;;  %v4928_v16 = vcombine.low %v486_v4, %v490_v5  ;;  %v4937_v17 = vcombine.high %v494_v13, %v498_v57 }
 0x1fe   :  { %v4939_v18 = vcombine.high %v495_v14, %v499_v15  ;;  %v4938_v26 = vcombine.low %v495_v14, %v499_v15  ;;  %v554_v14 = vld [vmem:[#allocation5 + $0xe30] sm:$0xff]  ;;  %v551_v15 = vld [vmem:[#allocation5 + $0xe18] sm:$0xff] }
 0x200   :  { %3600 = vmatpush1.bf16.msra.mxu0 %v4872_v20  ;;  %3764 = vmatpush1.bf16.msra.mxu1 %v4874_v21  ;;  %v506_v20 = vld [vmem:[#allocation5 + $0xcb0] sm:$0xff]  ;;  %v503_v21 = vld [vmem:[#allocation5 + $0xc98] sm:$0xff] }
 0x201   :  { %3601 = vmatprep.subr.bf16.mxu0 %v4881_v22  ;;  %3765 = vmatprep.subr.bf16.mxu1 %v4883_v24  ;;  %v507_v22 = vld [vmem:[#allocation5 + $0xcb8] sm:$0xff]  ;;  %v4936_v24 = vcombine.low %v494_v13, %v498_v57  ;;  %v4945_v27 = vcombine.high %v502_v19, %v506_v20  ;;  %v550_v57 = vld [vmem:[#allocation5 + $0xe10] sm:$0xff] }
 0x202   :  { %v4947_v25 = vcombine.high %v503_v21, %v507_v22 }
 0x204   :  { %3602 = vmatpush1.bf16.msra.mxu0 %v4880_v28  ;;  %3766 = vmatpush1.bf16.msra.mxu1 %v4882_v29  ;;  %v514_v28 = vld [vmem:[#allocation5 + $0xcf0] sm:$0xff]  ;;  %v511_v29 = vld [vmem:[#allocation5 + $0xcd8] sm:$0xff] }
 0x205   :  { %3603 = vmatprep.subr.bf16.mxu0 %v4889_v30  ;;  %3767 = vmatprep.subr.bf16.mxu1 %v4891_v31  ;;  %v515_v30 = vld [vmem:[#allocation5 + $0xcf8] sm:$0xff]  ;;  %v4944_v31 = vcombine.low %v502_v19, %v506_v20  ;;  %v4953_v32 = vcombine.high %v510_v23, %v514_v28  ;;  %v558_v20 = vld [vmem:[#allocation5 + $0xe50] sm:$0xff] }
 0x206   :  { %v4955_v34 = vcombine.high %v511_v29, %v515_v30 }
 0x208   :  { %3604 = vmatpush1.bf16.msra.mxu0 %v4888_v33  ;;  %3768 = vmatpush1.bf16.msra.mxu1 %v4890_v38  ;;  %v519_v33 = vld [vmem:[#allocation5 + $0xd18] sm:$0xff] }
 0x209   :  { %3605 = vmatprep.subr.bf16.mxu0 %v4897_v39  ;;  %3769 = vmatprep.subr.bf16.mxu1 %v4899_v40  ;;  %v523_v38 = vld [vmem:[#allocation5 + $0xd38] sm:$0xff]  ;;  %v4952_v39 = vcombine.low %v510_v23, %v514_v28  ;;  %v4954_v40 = vcombine.low %v511_v29, %v515_v30  ;;  %v566_v28 = vld [vmem:[#allocation5 + $0xe90] sm:$0xff] }
 0x20a   :  { %v570_v29 = vld [vmem:[#allocation5 + $0xeb0] sm:$0xff]  ;;  %v567_v30 = vld [vmem:[#allocation5 + $0xe98] sm:$0xff] }
 0x20c   :  { %3606 = vmatpush1.bf16.msra.mxu0 %v4896_v47  ;;  %3770 = vmatpush1.bf16.msra.mxu1 %v4898_v48  ;;  %v531_v47 = vld [vmem:[#allocation5 + $0xd78] sm:$0xff]  ;;  %v4960_v48 = vcombine.low %v518_v35, %v522_v37  ;;  %v574_v37 = vld [vmem:[#allocation5 + $0xed0] sm:$0xff] }
 0x20d   :  { %3607 = vmatprep.subr.bf16.mxu0 %v4905_v49  ;;  %3771 = vmatprep.subr.bf16.mxu1 %v4907_v50  ;;  %v4962_v49 = vcombine.low %v519_v33, %v523_v38  ;;  %v4969_v50 = vcombine.high %v526_v42, %v530_v43  ;;  %v4971_v51 = vcombine.high %v527_v44, %v531_v47 }
 0x210   :  { %3608 = vmatpush1.bf16.msra.mxu0 %v4904_v55  ;;  %3772 = vmatpush1.bf16.msra.mxu1 %v4906_v56  ;;  %v539_v55 = vld [vmem:[#allocation5 + $0xdb8] sm:$0xff]  ;;  %v4968_v56 = vcombine.low %v526_v42, %v530_v43 }
 0x211   :  { %3609 = vmatprep.subr.bf16.mxu0 %v4913_v58  ;;  %3773 = vmatprep.subr.bf16.mxu1 %v4915_v59  ;;  %v4970_v58 = vcombine.low %v527_v44, %v531_v47  ;;  %v4977_v59 = vcombine.high %v534_v52, %v538_v53  ;;  %v4979_v61 = vcombine.high %v535_v54, %v539_v55  ;;  %v582_v44 = vld [vmem:[#allocation5 + $0xf10] sm:$0xff] }
 0x212   :  { %v586_v47 = vld [vmem:[#allocation5 + $0xf30] sm:$0xff] }
 0x213   :  { %v5025_v53 = vcombine.high %v582_v44, %v586_v47 }
 0x214   :  { %3610 = vmatpush1.bf16.msra.mxu0 %v4912_v0  ;;  %3774 = vmatpush1.bf16.msra.mxu1 %v4914_v1 }
 0x215   :  { %3611 = vmatprep.subr.bf16.mxu0 %v4921_v2  ;;  %3775 = vmatprep.subr.bf16.mxu1 %v4923_v3  ;;  %v543_v2 = vld [vmem:[#allocation5 + $0xdd8] sm:$0xff] }
 0x216   :  { %v547_v3 = vld [vmem:[#allocation5 + $0xdf8] sm:$0xff] }
 0x217   :  { %v4987_v13 = vcombine.high %v543_v2, %v547_v3 }
 0x218   :  { %3612 = vmatpush1.bf16.msra.mxu0 %v4920_v8  ;;  %3776 = vmatpush1.bf16.msra.mxu1 %v4922_v9  ;;  %v4978_v9 = vcombine.low %v535_v54, %v539_v55  ;;  %v590_v55 = vld [vmem:[#allocation5 + $0xf50] sm:$0xff] }
 0x219   :  { %3622 = vmatprep.subr.bf16.mxu0 %v4929_v10  ;;  %3786 = vmatprep.subr.bf16.mxu1 %v4931_v11  ;;  %v4985_v10 = vcombine.high %v542_v62, %v546_v63 }
 0x21b   :  { %3614 = vmatmul.mubr.bf16.vlgmr.msra.gmra.mrb[4].mxu0 %v5603_v36  ;;  %3778 = vmatmul.mubr.bf16.vlgmr.msra.gmra.mrb[4].mxu1 %v5603_v36  ;;  %v4946_v36 = vcombine.low %v503_v21, %v507_v22  ;;  %v562_v21 = vld [vmem:[#allocation5 + $0xe70] sm:$0xff]  ;;  %v559_v22 = vld [vmem:[#allocation5 + $0xe58] sm:$0xff] }
 0x21c   :  { %3623 = vmatpush1.bf16.msra.mxu0 %v4928_v16  ;;  %3787 = vmatpush1.bf16.msra.mxu1 %v4930_v12  ;;  %v555_v16 = vld [vmem:[#allocation5 + $0xe38] sm:$0xff]  ;;  %v4984_v12 = vcombine.low %v542_v62, %v546_v63  ;;  %v5648_v62 = vld [vmem:[#allocation7] sm:$0xff] }
 0x21d   :  { %3624 = vmatprep.subr.bf16.mxu0 %v4937_v17  ;;  %3788 = vmatprep.subr.bf16.mxu1 %v4939_v18  ;;  %v4986_v17 = vcombine.low %v543_v2, %v547_v3  ;;  %v4993_v18 = vcombine.high %v550_v57, %v554_v14  ;;  %v4995_v19 = vcombine.high %v551_v15, %v555_v16 }
 0x21e   :  { %5049 = vmatprep.mubr.msk.bf16.mxu0 %vm3142_vm0, %v5605_v46  ;;  %5051 = vmatprep.mubr.msk.bf16.mxu1 %vm3142_vm0, %v5605_v46  ;;  %v4963_v46 = vcombine.high %v519_v33, %v523_v38  ;;  %v578_v33 = vld [vmem:[#allocation5 + $0xef0] sm:$0xff]  ;;  %v602_v38 = vlaneseq  ;;  %v5024_v2 = vcombine.low %v582_v44, %v586_v47 }
 0x21f   :  { %v5017_v42 = vcombine.high %v574_v37, %v578_v33  ;;  %v5301_v44 = vld [vmem:[#allocation8 + $0x28] sm:$0xff]  }
 0x220   :  { %3625 = vmatpush1.bf16.msra.mxu0 %v4936_v24  ;;  %3789 = vmatpush1.bf16.msra.mxu1 %v4938_v26  ;;  %v563_v24 = vld [vmem:[#allocation5 + $0xe78] sm:$0xff]  ;;  %v4992_v26 = vcombine.low %v550_v57, %v554_v14 }
 0x221   :  { %3626 = vmatprep.subr.bf16.mxu0 %v4945_v27  ;;  %3790 = vmatprep.subr.bf16.mxu1 %v4947_v25  ;;  %v4994_v27 = vcombine.low %v551_v15, %v555_v16  ;;  %v5001_v25 = vcombine.high %v558_v20, %v562_v21  ;;  %v5003_v23 = vcombine.high %v559_v22, %v563_v24 }
 0x224   :  { %3627 = vmatpush1.bf16.msra.mxu0 %v4944_v31  ;;  %3791 = vmatpush1.bf16.msra.mxu1 %v4946_v36  ;;  %v571_v31 = vld [vmem:[#allocation5 + $0xeb8] sm:$0xff]  ;;  %v5000_v36 = vcombine.low %v558_v20, %v562_v21  ;;  %v5280_v21 = vld [vmem:[#allocation8 + $0xc0] sm:$0xff]  }
 0x225   :  { %3628 = vmatprep.subr.bf16.mxu0 %v4953_v32  ;;  %3792 = vmatprep.subr.bf16.mxu1 %v4955_v34  ;;  %v5002_v32 = vcombine.low %v559_v22, %v563_v24  ;;  %v5009_v34 = vcombine.high %v566_v28, %v570_v29  ;;  %v5011_v35 = vcombine.high %v567_v30, %v571_v31 }
 0x228   :  { %3629 = vmatpush1.bf16.msra.mxu0 %v4952_v39  ;;  %3793 = vmatpush1.bf16.msra.mxu1 %v4954_v40  ;;  %v575_v39 = vld [vmem:[#allocation5 + $0xed8] sm:$0xff] }
 0x229   :  { %3630 = vmatprep.subr.bf16.mxu0 %v4961_v41  ;;  %3794 = vmatprep.subr.bf16.mxu1 %v4963_v46  ;;  %v579_v40 = vld [vmem:[#allocation5 + $0xef8] sm:$0xff]  ;;  %v5008_v41 = vcombine.low %v566_v28, %v570_v29  ;;  %v5010_v46 = vcombine.low %v567_v30, %v571_v31  ;;  %v5285_v28 = vld [vmem:[#allocation8 + $0x8] sm:$0xff]  }
 0x22a   :  { %v5019_v43 = vcombine.high %v575_v39, %v579_v40  ;;  %v5018_v52 = vcombine.low %v575_v39, %v579_v40  ;;  %v5286_v29 = vld [vmem:[#allocation8 + $0x88] sm:$0xff]   ;;  %v5287_v30 = vld [vmem:[#allocation8 + $0x50] sm:$0xff]   ;;  %v5297_v39 = vld [vmem:[#allocation8 + $0x20] sm:$0xff]  }
 0x22b   :  { %v5288_v31 = vld [vmem:[#allocation8 + $0xd0] sm:$0xff]  }
 0x22c   :  { %3631 = vmatpush1.bf16.msra.mxu0 %v4960_v48  ;;  %3795 = vmatpush1.bf16.msra.mxu1 %v4962_v49  ;;  %v5645_v48 = vshrl.u32 %v602_v38, 7  ;;  %v583_v49 = vld [vmem:[#allocation5 + $0xf18] sm:$0xff]  ;;  %v5296_v38 = vld [vmem:[#allocation8 + $0xe0] sm:$0xff]  }
 0x22d   :  { %3632 = vmatprep.subr.bf16.mxu0 %v4969_v50  ;;  %3796 = vmatprep.subr.bf16.mxu1 %v4971_v51  ;;  %v587_v50 = vld [vmem:[#allocation5 + $0xf38] sm:$0xff]  ;;  %v5016_v51 = vcombine.low %v574_v37, %v578_v33  ;;  %v5294_v37 = vld [vmem:[#allocation8 + $0x98] sm:$0xff]   ;;  %v5295_v33 = vld [vmem:[#allocation8 + $0x60] sm:$0xff]  }
 0x22e   :  { %v5637_v60 = vpop.f32.mrb[0].mxu0  ;;  %v5639_v0 = vpop.f32.mrb[0].mxu1  ;;  %v5027_v54 = vcombine.high %v583_v49, %v587_v50  ;;  %v616_v63 = vsub.s32 3, %v5645_v48  ;;  %v5026_v3 = vcombine.low %v583_v49, %v587_v50  ;;  %v604_v40 = vsub.s32 0, %v5645_v48  ;;  %v5302_v49 = vld [vmem:[#allocation8 + $0xa8] sm:$0xff]   ;;  %v5303_v50 = vld [vmem:[#allocation8 + $0x70] sm:$0xff]  }
 0x22f   :  { %v5641_v1 = vpop.f32.mrb[1].mxu0  ;;  %v5643_v4 = vpop.f32.mrb[1].mxu1 }
 0x230   :  { %v3332_v5 = vpop.f32.mrb[2].mxu0  ;;  %3633 = vmatpush1.bf16.msra.mxu0 %v4968_v56  ;;  %v3496_v7 = vpop.f32.mrb[2].mxu1  ;;  %3797 = vmatpush1.bf16.msra.mxu1 %v4970_v58  ;;  %v594_v56 = vld [vmem:[#allocation5 + $0xf70] sm:$0xff]  ;;  %v608_v58 = vsub.s32 1, %v5645_v48  ;;  %v605_v47 = vrot.slane %v5648_v62, %v604_v40 }
 0x231   :  { %v3333_v8 = vpop.f32.mrb[3].mxu0  ;;  %3634 = vmatprep.subr.bf16.mxu0 %v4977_v59  ;;  %v3497_v11 = vpop.f32.mrb[3].mxu1  ;;  %3798 = vmatprep.subr.bf16.mxu1 %v4979_v61  ;;  %v591_v59 = vld [vmem:[#allocation5 + $0xf58] sm:$0xff]  ;;  %v5033_v5 = vcombine.high %v590_v55, %v594_v56  ;;  %v598_v7 = vld [vmem:[#allocation5 + $0xf90] sm:$0xff] }
 0x232   :  { %v595_v61 = vld [vmem:[#allocation5 + $0xf78] sm:$0xff]  ;;  %v609_v8 = vrot.slane %v5648_v62, %v608_v58  ;;  %v5032_v11 = vcombine.low %v590_v55, %v594_v56  ;;  %v5041_v57 = vcombine.high %v598_v7, %v598_v7  ;;  %v5040_v14 = vcombine.low %v598_v7, %v598_v7  ;;  %v5307_v56 = vld [vmem:[#allocation8 + $0x78] sm:$0xff]  }
 0x233   :  { %v5306_v55 = vld [vmem:[#allocation8 + $0xb0] sm:$0xff]  }
 0x234   :  { %3635 = vmatpush1.bf16.msra.mxu0 %v4976_v6  ;;  %3799 = vmatpush1.bf16.msra.mxu1 %v4978_v9  ;;  %v5035_v6 = vcombine.high %v591_v59, %v595_v61  ;;  %v599_v9 = vld [vmem:[#allocation5 + $0xf98] sm:$0xff] }
 0x235   :  { %3636 = vmatprep.subr.bf16.mxu0 %v4985_v10  ;;  %3800 = vmatprep.subr.bf16.mxu1 %v4987_v13  ;;  %v617_v10 = vrot.slane %v5648_v62, %v616_v63  ;;  %v5034_v13 = vcombine.low %v591_v59, %v595_v61  ;;  %v5043_v15 = vcombine.high %v599_v9, %v599_v9  ;;  %v5308_v59 = vld [vmem:[#allocation8 + $0xf8] sm:$0xff]  }
 0x236   :  { %v5042_v16 = vcombine.low %v599_v9, %v599_v9  ;;  %v5309_v61 = vld [vmem:[#allocation8 + $0x38] sm:$0xff]   ;;  %v5315_v9 = vld [vmem:[#allocation8 + $0x148] sm:$0xff]  }
 0x238   :  { %3637 = vmatpush1.bf16.msra.mxu0 %v4984_v12  ;;  %3801 = vmatpush1.bf16.msra.mxu1 %v4986_v17  ;;  %v5206_v12 = vadd.f32 %v5641_v1, %v609_v8  ;;  %v5208_v17 = vadd.f32 %v5643_v4, %v617_v10  ;;  %v3166_v20 = vsel %vm3146_vm1, %v5042_v16, 0  ;;  %v5282_v1 = vld [vmem:[#allocation8 + $0x80] sm:$0xff]   ;;  %v5283_v4 = vld [vmem:[#allocation8 + $0x48] sm:$0xff]   ;;  %v5322_v16 = vld [vmem:[#allocation8 + $0x190] sm:$0xff]  }
 0x239   :  { %3638 = vmatprep.subr.bf16.mxu0 %v4993_v18  ;;  %3802 = vmatprep.subr.bf16.mxu1 %v4995_v19  ;;  %v3160_v18 = vsel %vm3146_vm1, %v5040_v14, 0  ;;  %v5279_v19 = vld [vmem:[#allocation8 + $0x40] sm:$0xff]   ;;  %v5316_v10 = vld [vmem:[#allocation8 + $0x1c8] sm:$0xff]   ;;  %v5320_v14 = vld [vmem:[#allocation8 + $0x1d0] sm:$0xff]  }
 0x23a   :  { %v3828_v22 = vmax.f32 %v5206_v12, 0.0  ;;  %v3830_v24 = vmax.f32 %v5208_v17, 0.0  ;;  %v5314_v8 = vld [vmem:[#allocation8 + $0x180] sm:$0xff]   ;;  %v5323_v12 = vld [vmem:[#allocation8 + $0x158] sm:$0xff]  }
 0x23b   :  { %v5324_v17 = vld [vmem:[#allocation8 + $0x1d8] sm:$0xff]  }
 0x23c   :  { %3639 = vmatpush1.bf16.msra.mxu0 %v4992_v26  ;;  %3803 = vmatpush1.bf16.msra.mxu1 %v4994_v27  ;;  %v5281_v26 = vld [vmem:[#allocation8] sm:$0xff]   ;;  %v3836_v27 = vpack.c.bf16 %v3828_v22, %v3828_v22 }
 0x23d   :  { %3640 = vmatprep.subr.bf16.mxu0 %v5001_v25  ;;  %3804 = vmatprep.subr.bf16.mxu1 %v5003_v23  ;;  %v5284_v25 = vld [vmem:[#allocation8 + $0xc8] sm:$0xff]   ;;  %v3838_v23 = vpack.c.bf16 %v3830_v24, %v3830_v24  ;;  %v5329_v22 = vld [vmem:[#allocation8 + $0x120] sm:$0xff]  }
 0x23e   :  { %v5330_v24 = vld [vmem:[#allocation8 + $0x1a0] sm:$0xff]  }
 0x240   :  { %3641 = vmatpush1.bf16.msra.mxu0 %v5000_v36  ;;  %3805 = vmatpush1.bf16.msra.mxu1 %v5002_v32  ;;  %v5289_v36 = vld [vmem:[#allocation8 + $0x10] sm:$0xff]  }
 0x241   :  { %3642 = vmatprep.subr.bf16.mxu0 %v5009_v34  ;;  %3806 = vmatprep.subr.bf16.mxu1 %v5011_v35  ;;  %v5290_v32 = vld [vmem:[#allocation8 + $0x90] sm:$0xff]   ;;  %v5291_v34 = vld [vmem:[#allocation8 + $0x58] sm:$0xff]  }
 0x242   :  { %v5292_v35 = vld [vmem:[#allocation8 + $0xd8] sm:$0xff]  }
 0x244   :  { %3643 = vmatpush1.bf16.msra.mxu0 %v5008_v41  ;;  %3807 = vmatpush1.bf16.msra.mxu1 %v5010_v46  ;;  %v5298_v41 = vld [vmem:[#allocation8 + $0xa0] sm:$0xff]   ;;  %v5299_v46 = vld [vmem:[#allocation8 + $0x68] sm:$0xff]  }
 0x245   :  { %3644 = vmatprep.subr.bf16.mxu0 %v5017_v42  ;;  %3808 = vmatprep.subr.bf16.mxu1 %v5019_v43  ;;  %v612_v42 = vsub.s32 2, %v5645_v48  ;;  %v5300_v43 = vld [vmem:[#allocation8 + $0xe8] sm:$0xff]  }
 0x248   :  { %3645 = vmatpush1.bf16.msra.mxu0 %v5016_v51  ;;  %3809 = vmatpush1.bf16.msra.mxu1 %v5018_v52  ;;  %v613_v51 = vrot.slane %v5648_v62, %v612_v42  ;;  %v5304_v52 = vld [vmem:[#allocation8 + $0xf0] sm:$0xff]  }
 0x249   :  { %3646 = vmatprep.subr.bf16.mxu0 %v5025_v53  ;;  %3810 = vmatprep.subr.bf16.mxu1 %v5027_v54  ;;  %v5305_v53 = vld [vmem:[#allocation8 + $0x30] sm:$0xff]   ;;  %v5205_v54 = vadd.f32 %v5637_v60, %v605_v47  ;;  %v5313_v60 = vld [vmem:[#allocation8 + $0x100] sm:$0xff]  }
 0x24a   :  { %v5207_v58 = vadd.f32 %v5639_v0, %v613_v51 }
 0x24b   :  { %v3827_v63 = vmax.f32 %v5205_v54, 0.0 }
 0x24c   :  { %3647 = vmatpush1.bf16.msra.mxu0 %v5024_v2  ;;  %3811 = vmatpush1.bf16.msra.mxu1 %v5026_v3  ;;  %v5310_v2 = vld [vmem:[#allocation8 + $0xb8] sm:$0xff]   ;;  %v5311_v3 = vld [vmem:[#allocation8 + $0x140] sm:$0xff]  }
 0x24d   :  { %3648 = vmatprep.subr.bf16.mxu0 %v5033_v5  ;;  %3812 = vmatprep.subr.bf16.mxu1 %v5035_v6  ;;  %v3829_v5 = vmax.f32 %v5207_v58, 0.0  ;;  %v5312_v6 = vld [vmem:[#allocation8 + $0x1c0] sm:$0xff]   ;;  %v3835_v7 = vpack.c.bf16 %v3827_v63, %v3827_v63 }
 0x24f   :  { %v3837_v0 = vpack.c.bf16 %v3829_v5, %v3829_v5  ;;  %v5052_v5 = vld [vmem:[#allocation10] ss:$0 sm:$0xff] }
 0x250   :  { %3649 = vmatpush1.bf16.msra.mxu0 %v5032_v11  ;;  %3813 = vmatpush1.bf16.msra.mxu1 %v5034_v13  ;;  %v5317_v11 = vld [vmem:[#allocation8 + $0x108] sm:$0xff]  }
 0x251   :  { %5048 = vmatprep.subr.msk.bf16.mxu0 %vm3146_vm1, %v5041_v57  ;;  %5050 = vmatprep.subr.msk.bf16.mxu1 %vm3146_vm1, %v5043_v15  ;;  %v5318_v13 = vld [vmem:[#allocation8 + $0x188] sm:$0xff]   ;;  %v5319_v57 = vld [vmem:[#allocation8 + $0x150] sm:$0xff]  }
 0x252   :  { %v5321_v15 = vld [vmem:[#allocation8 + $0x110] sm:$0xff]  }
 0x254   :  { %3651 = vmatpush1.bf16.msra.mxu0 %v3160_v18  ;;  %3815 = vmatpush1.bf16.msra.mxu1 %v3166_v20  ;;  %v5325_v18 = vld [vmem:[#allocation8 + $0x118] sm:$0xff]   ;;  %v5327_v20 = vld [vmem:[#allocation8 + $0x160] sm:$0xff]  }
 0x255   :  { %5117 = vmatprep.subr.bf16.mxu0 %v5279_v19  ;;  %5139 = vmatprep.subr.bf16.mxu1 %v5280_v21  ;;  %v5326_v19 = vld [vmem:[#allocation8 + $0x198] sm:$0xff]   ;;  %v5328_v21 = vld [vmem:[#allocation8 + $0x1e0] sm:$0xff]  }
 0x257   :  { %3655 = vmatmul.mubr.bf16.vlgmr.msra.gmra.mrb[4].mxu0 %v5617_v45  ;;  %3819 = vmatmul.mubr.bf16.vlgmr.msra.gmra.mrb[4].mxu1 %v5617_v45  ;;  %v5293_v45 = vld [vmem:[#allocation8 + $0x18] sm:$0xff]  }
 0x258   :  { %5118 = vmatpush3.bf16.msra.mxu0 %v5281_v26  ;;  %4394 = vmatprep.mubr.bf16.mxu0 %v3836_v27  ;;  %v5331_v26 = vld [vmem:[#allocation8 + $0x168] sm:$0xff]  }
 0x259   :  { %5140 = vmatpush3.bf16.msra.mxu1 %v5282_v1  ;;  %4434 = vmatprep.mubr.bf16.mxu1 %v3838_v23  ;;  %v5332_v1 = vld [vmem:[#allocation8 + $0x1e8] sm:$0xff]   ;;  %v5336_v23 = vld [vmem:[#allocation8 + $0x1f0] sm:$0xff]  }
 0x25a   :  { %5119 = vmatprep.subr.bf16.mxu0 %v5283_v4  ;;  %5141 = vmatprep.subr.bf16.mxu1 %v5284_v25  ;;  %v5333_v4 = vld [vmem:[#allocation8 + $0x128] sm:$0xff]   ;;  %v5335_v25 = vld [vmem:[#allocation8 + $0x170] sm:$0xff]  }
 0x25b   :  { %v5334_v27 = vld [vmem:[#allocation8 + $0x1a8] sm:$0xff]  }
 0x25c   :  { %5120 = vmatpush3.bf16.msra.mxu0 %v5285_v28  ;;  %v5337_v28 = vld [vmem:[#allocation8 + $0x130] sm:$0xff]  }
 0x25d   :  { %5142 = vmatpush3.bf16.msra.mxu1 %v5286_v29  ;;  %5121 = vmatprep.subr.bf16.mxu0 %v5287_v30  ;;  %v5338_v29 = vld [vmem:[#allocation8 + $0x1b0] sm:$0xff]   ;;  %v5339_v30 = vld [vmem:[#allocation8 + $0x178] sm:$0xff]  }
 0x25e   :  { %5143 = vmatprep.subr.bf16.mxu1 %v5288_v31  ;;  %v5340_v31 = vld [vmem:[#allocation8 + $0x1f8] sm:$0xff]  }
 0x260   :  { %5122 = vmatpush3.bf16.msra.mxu0 %v5289_v36  ;;  %v5341_v36 = vld [vmem:[#allocation8 + $0x138] sm:$0xff]  }
 0x261   :  { %5144 = vmatpush3.bf16.msra.mxu1 %v5290_v32  ;;  %5123 = vmatprep.subr.bf16.mxu0 %v5291_v34  ;;  %v5342_v32 = vld [vmem:[#allocation8 + $0x1b8] sm:$0xff]   ;;  %v620_v34 = vsub.s32 4, %v5645_v48 }
 0x262   :  { %5145 = vmatprep.subr.bf16.mxu1 %v5292_v35  ;;  %v628_v35 = vsub.s32 6, %v5645_v48 }
 0x264   :  { %5124 = vmatpush3.bf16.msra.mxu0 %v5293_v45  ;;  %v624_v45 = vsub.s32 5, %v5645_v48 }
 0x265   :  { %5146 = vmatpush3.bf16.msra.mxu1 %v5294_v37  ;;  %5125 = vmatprep.subr.bf16.mxu0 %v5295_v33  ;;  %v632_v37 = vsub.s32 7, %v5645_v48  ;;  %v621_v33 = vrot.slane %v5648_v62, %v620_v34 }
 0x266   :  { %5147 = vmatprep.subr.bf16.mxu1 %v5296_v38  ;;  %v629_v38 = vrot.slane %v5648_v62, %v628_v35 }
 0x267   :  { %v633_v40 = vrot.slane %v5648_v62, %v632_v37 }
 0x268   :  { %5126 = vmatpush3.bf16.msra.mxu0 %v5297_v39  ;;  %v625_v39 = vrot.slane %v5648_v62, %v624_v45 }
 0x269   :  { %5148 = vmatpush3.bf16.msra.mxu1 %v5298_v41  ;;  %5127 = vmatprep.subr.bf16.mxu0 %v5299_v46 }
 0x26a   :  { %5149 = vmatprep.subr.bf16.mxu1 %v5300_v43 }
 0x26c   :  { %5128 = vmatpush3.bf16.msra.mxu0 %v5301_v44 }
 0x26d   :  { %5150 = vmatpush3.bf16.msra.mxu1 %v5302_v49  ;;  %5129 = vmatprep.subr.bf16.mxu0 %v5303_v50 }
 0x26e   :  { %5151 = vmatprep.subr.bf16.mxu1 %v5304_v52 }
 0x270   :  { %5130 = vmatpush3.bf16.msra.mxu0 %v5305_v53 }
 0x271   :  { %5152 = vmatpush3.bf16.msra.mxu1 %v5306_v55  ;;  %5131 = vmatprep.subr.bf16.mxu0 %v5307_v56 }
 0x272   :  { %5153 = vmatprep.subr.bf16.mxu1 %v5308_v59 }
 0x274   :  { %5132 = vmatpush3.bf16.msra.mxu0 %v5309_v61 }
 0x275   :  { %5154 = vmatpush3.bf16.msra.mxu1 %v5310_v2  ;;  %5161 = vmatprep.subr.bf16.mxu0 %v5311_v3 }
 0x276   :  { %5183 = vmatprep.subr.bf16.mxu1 %v5312_v6 }
 0x277   :  { %4395 = vmatmul.mubr.bf16.vlgmr.msra.gmra.mrb[8].mxu0 %v3835_v7 }
 0x278   :  { %4435 = vmatmul.mubr.bf16.vlgmr.msra.gmra.mrb[8].mxu1 %v3837_v0  ;;  %5162 = vmatpush3.bf16.msra.mxu0 %v5313_v60 }
 0x279   :  { %5184 = vmatpush3.bf16.msra.mxu1 %v5314_v8  ;;  %5163 = vmatprep.subr.bf16.mxu0 %v5315_v9 }
 0x27a   :  { %5185 = vmatprep.subr.bf16.mxu1 %v5316_v10 }
 0x27c   :  { %5164 = vmatpush3.bf16.msra.mxu0 %v5317_v11 }
 0x27d   :  { %5186 = vmatpush3.bf16.msra.mxu1 %v5318_v13  ;;  %5165 = vmatprep.subr.bf16.mxu0 %v5319_v57 }
 0x27e   :  { %5187 = vmatprep.subr.bf16.mxu1 %v5320_v14 }
 0x280   :  { %5166 = vmatpush3.bf16.msra.mxu0 %v5321_v15 }
 0x281   :  { %5188 = vmatpush3.bf16.msra.mxu1 %v5322_v16  ;;  %5167 = vmatprep.subr.bf16.mxu0 %v5323_v12 }
 0x282   :  { %5189 = vmatprep.subr.bf16.mxu1 %v5324_v17 }
 0x284   :  { %5168 = vmatpush3.bf16.msra.mxu0 %v5325_v18 }
 0x285   :  { %5190 = vmatpush3.bf16.msra.mxu1 %v5326_v19  ;;  %5169 = vmatprep.subr.bf16.mxu0 %v5327_v20 }
 0x286   :  { %5191 = vmatprep.subr.bf16.mxu1 %v5328_v21 }
 0x288   :  { %5170 = vmatpush3.bf16.msra.mxu0 %v5329_v22 }
 0x289   :  { %5192 = vmatpush3.bf16.msra.mxu1 %v5330_v24  ;;  %5171 = vmatprep.subr.bf16.mxu0 %v5331_v26 }
 0x28a   :  { %5193 = vmatprep.subr.bf16.mxu1 %v5332_v1 }
 0x28c   :  { %5172 = vmatpush3.bf16.msra.mxu0 %v5333_v4 }
 0x28d   :  { %5194 = vmatpush3.bf16.msra.mxu1 %v5334_v27  ;;  %5173 = vmatprep.subr.bf16.mxu0 %v5335_v25 }
 0x28e   :  { %5195 = vmatprep.subr.bf16.mxu1 %v5336_v23 }
 0x290   :  { %5174 = vmatpush3.bf16.msra.mxu0 %v5337_v28 }
 0x291   :  { %5196 = vmatpush3.bf16.msra.mxu1 %v5338_v29  ;;  %5175 = vmatprep.subr.bf16.mxu0 %v5339_v30 }
 0x292   :  { %5197 = vmatprep.subr.bf16.mxu1 %v5340_v31 }
 0x294   :  { %5176 = vmatpush3.bf16.msra.mxu0 %v5341_v36 }
 0x295   :  { %5198 = vmatpush3.bf16.msra.mxu1 %v5342_v32 }
 0x32a   :  { %v3656_v41 = vpop.f32.mrb[4].mxu0  ;;  %v3820_v42 = vpop.f32.mrb[4].mxu1 }
 0x32b   :  { %v5209_v46 = vadd.f32 %v3656_v41, %v621_v33  ;;  %v3658_v43 = vpop.f32.mrb[5].mxu0  ;;  %v5211_v44 = vadd.f32 %v3820_v42, %v629_v38  ;;  %v3822_v49 = vpop.f32.mrb[5].mxu1 }
 0x32c   :  { %v5210_v47 = vadd.f32 %v3658_v43, %v625_v39  ;;  %v3660_v50 = vpop.f32.mrb[6].mxu0  ;;  %v5212_v52 = vadd.f32 %v3822_v49, %v633_v40  ;;  %v3824_v53 = vpop.f32.mrb[6].mxu1 }
 0x32d   :  { %v3831_v51 = vmax.f32 %v5209_v46, 0.0  ;;  %v3661_v48 = vpop.f32.mrb[7].mxu0  ;;  %v3833_v54 = vmax.f32 %v5211_v44, 0.0  ;;  %v3825_v56 = vpop.f32.mrb[7].mxu1 }
 0x32e   :  { %v3832_v55 = vmax.f32 %v5210_v47, 0.0  ;;  %v3834_v58 = vmax.f32 %v5212_v52, 0.0 }
 0x32f   :  { %v3839_v61 = vpack.c.bf16 %v3831_v51, %v3831_v51  ;;  %v3841_v62 = vpack.c.bf16 %v3833_v54, %v3833_v54 }
 0x330   :  { %v3840_v59 = vpack.c.bf16 %v3832_v55, %v3832_v55  ;;  %v3842_v63 = vpack.c.bf16 %v3834_v58, %v3834_v58 }
 0x332   :  { %4474 = vmatprep.mubr.bf16.mxu0 %v3840_v59  ;;  %4514 = vmatprep.mubr.bf16.mxu1 %v3842_v63 }
 0x333   :  { %4475 = vmatmul.mubr.bf16.vlgmr.msra.gmra.mrb[12].mxu0 %v3839_v61  ;;  %4515 = vmatmul.mubr.bf16.vlgmr.msra.gmra.mrb[12].mxu1 %v3841_v62 }
 0x34a   :  { %v5133_v2 = vpop.f32.mrb[8].mxu0 }
 0x34b   :  { %v5155_v3 = vpop.f32.mrb[8].mxu1  ;;  %v5134_v6 = vpop.f32.mrb[9].mxu0 }
 0x34c   :  { %v5135_v60 = vadd.f32 %v5134_v6, %v5133_v2  ;;  %v5156_v7 = vpop.f32.mrb[9].mxu1  ;;  %v5136_v8 = vpop.f32.mrb[10].mxu0 }
 0x34d   :  { %v5157_v9 = vadd.f32 %v5156_v7, %v5155_v3  ;;  %v5158_v0 = vpop.f32.mrb[10].mxu1  ;;  %v5137_v10 = vpop.f32.mrb[11].mxu0 }
 0x34e   :  { %v4397_v11 = vadd.f32 %v5135_v60, %v5052_v5  ;;  %v5159_v13 = vpop.f32.mrb[11].mxu1 }
 0x350   :  { %v4437_v57 = vadd.f32 %v5157_v9, %v4397_v11 }
 0x406   :  { %v5177_v14 = vpop.f32.mrb[12].mxu0  ;;  %v5199_v15 = vpop.f32.mrb[12].mxu1 }
 0x407   :  { %v5178_v16 = vpop.f32.mrb[13].mxu0  ;;  %v5200_v17 = vpop.f32.mrb[13].mxu1 }
 0x408   :  { %v5179_v12 = vadd.f32 %v5178_v16, %v5177_v14  ;;  %v5180_v18 = vpop.f32.mrb[14].mxu0  ;;  %v5201_v19 = vadd.f32 %v5200_v17, %v5199_v15  ;;  %v5202_v20 = vpop.f32.mrb[14].mxu1 }
 0x409   :  { %v5181_v21 = vpop.f32.mrb[15].mxu0  ;;  %v5203_v24 = vpop.f32.mrb[15].mxu1 }
 0x40a   :  { %v4477_v22 = vadd.f32 %v5179_v12, %v4437_v57 }
 0x40c   :  { %v4517_v26 = vadd.f32 %v5201_v19, %v4477_v22 }
 0x40e   :  { %4522 = vst [vmem:[#allocation11] sm:$0xff] %v4517_v26 }
 0x40f   :  { %5464 = shalt.err (!%p5461_p2)
}
 0x410   :  { %s5465_s6 = scalar_lea.hbm %s5692_s5, 128 }
 0x411   :  { %p5466_p3 = scmp.ne.s32.totalorder %s5692_s5, %s5465_s6  ;;  %p5469_p4 = scmp.lt.u32.totalorder %s5465_s6, %s5692_s5 }
 0x413   :  { %p5471_p5 = pnand %p5469_p4, %p5466_p3 }
 0x415   :  { %5474 = shalt.err (!%p5471_p5)
}
 0x416   :  { %4532 = dma.vmem_to_hbm [thread:$0]  %s4530_s28, 128, %s5692_s5, [#allocation4]  }
 0x417   :  { %5481 = dma.done.wait [#allocation4], 128  }
 0x418   :  { %5482 = vsyncadd [#allocation4], 4294967168 }
 0x419   :  { %4536 = vsyncpa [#allocation3], 1 }
 0x41a   :  { %4537 = vsyncpa [#allocation6], 1 }
 0x41b   :  { %4538 = vsyncpa [#allocation9], 1 }
 0x41c   :  { %4539 = vsyncpa [#allocation4], 1 }

</bundles_post_ra>
